<compile_context>
chip_gen: v7x
topology: tpu7x:2x2x1
jax: 0.10.0
libtpu: 0.0.40
codegen_flags: <defaults>
</compile_context>

<pallas_src>
import functools

import jax
import jax.numpy as jnp
from jax import lax
from jax.experimental import pallas as pl
from jax.experimental.pallas import tpu as pltpu


# ----------------------------------------------------------------------------
# Pallas kernel: fused concat + DoubleConv on one batch element.
# Layout: channels on sublanes, flattened spatial (H*W) on lanes (lane-dense).
# ----------------------------------------------------------------------------
def _up_double_conv_kernel(x2_ref, x1_ref, w1a_ref, w1b_ref, b1_ref,
                           w2_ref, b2_ref, lmask_ref, rmask_ref, o_ref,
                           *, H, W):
    # x2_ref  : (C2,  (H+4)*W)  skip connection, flat spatial + 2 zero halo rows/side
    # x1_ref  : (C1,  (H+4)*W)  upsampled deep features, same flat-halo layout
    # w1a_ref : (Cmid, 9*C2)    conv1 weights (BN1 scale folded), x2 channel slab
    # w1b_ref : (Cmid, 9*C1)    conv1 weights (BN1 scale folded), x1 channel slab
    # b1_ref  : (Cmid, 1)       folded BN1 bias
    # w2_ref  : (Cout, 9*Cmid)  conv2 weights (BN2 scale folded)
    # b2_ref  : (Cout, 1)       folded BN2 bias
    # lmask/rmask_ref : (1, H*W)  0/1 masks = conv's left/right zero padding on
    #                   the flattened-spatial layout
    # o_ref   : (Cout, H*W)     lane-dense output block
    HW = H * W
    lmask = lmask_ref[...]
    rmask = rmask_ref[...]

    def conv_patch(flat):
        # flat: (C, (H+4)*W).  Each 3x3 tap is a static-offset window of the
        # flat buffer (top/bottom conv padding comes from the zero halo rows,
        # left/right padding from the column masks).  Tap slabs are stacked on
        # the sublane axis -> patch (9*C, H*W), tap-major / channel-minor.
        slabs = []
        for dy in range(3):
            for dx in range(3):
                off = (dy + 1) * W + dx - 1
                s = flat[:, off:off + HW]
                if dx == 0:
                    s = s * lmask
                elif dx == 2:
                    s = s * rmask
                slabs.append(s)
        return jnp.concatenate(slabs, axis=0)

    # ---- conv1 (3x3, pad=1, no bias) + folded BN1 + ReLU --------------------
    # torch.cat([x2, x1], dim=1) is fused by splitting the contraction.
    acc1 = jnp.dot(w1a_ref[...], conv_patch(x2_ref[...]),
                   preferred_element_type=jnp.float32)
    acc1 = acc1 + jnp.dot(w1b_ref[...], conv_patch(x1_ref[...]),
                          preferred_element_type=jnp.float32)
    y1 = jnp.maximum(acc1 + b1_ref[...], 0.0)              # (Cmid, H*W)

    # ---- conv2 (3x3, pad=1, no bias) + folded BN2 + ReLU ---------------------
    # Re-pad the mid activation with the 2-row flat halo in registers
    # (no VMEM scratch round trip).
    zpad = jnp.zeros((y1.shape[0], 2 * W), jnp.float32)
    mid = jnp.concatenate([zpad, y1, zpad], axis=1)        # (Cmid, (H+4)*W)
    acc2 = jnp.dot(w2_ref[...], conv_patch(mid),
                   preferred_element_type=jnp.float32)
    y2 = jnp.maximum(acc2 + b2_ref[...], 0.0)              # (Cout, H*W)

    o_ref[...] = y2.astype(o_ref.dtype)


def up_double_conv_pallas(x2f, x1f, w1a, w1b, b1c, w2s, b2c, lmask, rmask,
                          *, H, W):
    """x2f: (N, C2, (H+4)*W), x1f: (N, C1, (H+4)*W)  ->  (N, Cout, H*W)."""
    N, C2, L = x2f.shape
    C1 = x1f.shape[1]
    Cmid = w1a.shape[0]
    Cout = w2s.shape[0]
    HW = H * W

    kernel = functools.partial(_up_double_conv_kernel, H=H, W=W)

    return pl.pallas_call(
        kernel,
        out_shape=jax.ShapeDtypeStruct((N, Cout, HW), jnp.float32),
        grid_spec=pltpu.PrefetchScalarGridSpec(
            num_scalar_prefetch=0,
            grid=(N,),
            in_specs=[
                pl.BlockSpec((None, C2, L), lambda n: (n, 0, 0)),
                pl.BlockSpec((None, C1, L), lambda n: (n, 0, 0)),
                pl.BlockSpec((Cmid, 9 * C2), lambda n: (0, 0)),
                pl.BlockSpec((Cmid, 9 * C1), lambda n: (0, 0)),
                pl.BlockSpec((Cmid, 1), lambda n: (0, 0)),
                pl.BlockSpec((Cout, 9 * Cmid), lambda n: (0, 0)),
                pl.BlockSpec((Cout, 1), lambda n: (0, 0)),
                pl.BlockSpec((1, HW), lambda n: (0, 0)),
                pl.BlockSpec((1, HW), lambda n: (0, 0)),
            ],
            out_specs=pl.BlockSpec((None, Cout, HW), lambda n: (n, 0, 0)),
        ),
        compiler_params=pltpu.CompilerParams(
            dimension_semantics=("parallel",),
            vmem_limit_bytes=48 * 1024 * 1024),
    )(x2f, x1f, w1a, w1b, b1c, w2s, b2c, lmask, rmask)


# ----------------------------------------------------------------------------
# JAX glue: bilinear 2x upsample (align_corners=True) + pads, all NCHW.
# ----------------------------------------------------------------------------
def upsample_bilinear_2x_align_corners(x):  # NCHW
    N, C, H, W = x.shape
    Ho, Wo = 2 * H, 2 * W

    def coords(out_size, in_size):
        if in_size == 1:
            z = jnp.zeros((out_size,), jnp.int32)
            return z, z, jnp.zeros((out_size,), jnp.float32)
        s = jnp.arange(out_size, dtype=jnp.float32) * (in_size - 1) / (out_size - 1)
        i0 = jnp.clip(jnp.floor(s).astype(jnp.int32), 0, in_size - 2)
        return i0, i0 + 1, s - i0.astype(jnp.float32)

    y0, y1, fy = coords(Ho, H)
    x0, x1, fx = coords(Wo, W)

    top = jnp.take(x, y0, axis=2)
    bot = jnp.take(x, y1, axis=2)

    def interp_w(a):
        l = jnp.take(a, x0, axis=3)
        r = jnp.take(a, x1, axis=3)
        return l * (1.0 - fx) + r * fx

    t, b = interp_w(top), interp_w(bot)
    fy_ = fy[None, None, :, None]
    return t * (1.0 - fy_) + b * fy_


def up_forward_pallas(x1, x2, params):
    """Full Up.forward: NCHW in, NCHW out.  Concat + DoubleConv run in Pallas."""
    x1u = upsample_bilinear_2x_align_corners(x1)
    N, C2, H, W = x2.shape
    diffY = H - x1u.shape[2]
    diffX = W - x1u.shape[3]
    x1p = jnp.pad(x1u, ((0, 0), (0, 0),
                        (diffY // 2, diffY - diffY // 2),
                        (diffX // 2, diffX - diffX // 2)))

    # Flatten spatial onto the lane axis and add a 2-row flat halo of zeros
    # (conv's top/bottom zero pad; 2 rows so every tap slice start is >= 0).
    def flat_halo(a):
        n, c = a.shape[:2]
        return jnp.pad(a.reshape(n, c, H * W), ((0, 0), (0, 0), (2 * W, 2 * W)))

    x2f = flat_halo(x2)
    x1f = flat_halo(x1p)

    # Column masks implementing the conv's left/right zero pad on the
    # flattened-spatial layout.
    col = jnp.arange(H * W, dtype=jnp.int32) % W
    lmask = (col != 0).astype(jnp.float32)[None, :]
    rmask = (col != W - 1).astype(jnp.float32)[None, :]

    y = up_double_conv_pallas(x2f, x1f,
                              params["w1a"], params["w1b"], params["b1c"],
                              params["w2s"], params["b2c"],
                              lmask, rmask, H=H, W=W)       # (N, Cout, H*W)
    return y.reshape(N, -1, H, W)                           # NCHW, no transpose


# ----------------------------------------------------------------------------
# Pure-JAX reference (lax.conv, unfolded BN) for correctness checking
# ----------------------------------------------------------------------------
def up_forward_ref(x1, x2, params):
    x1u = upsample_bilinear_2x_align_corners(x1)
    diffY = x2.shape[2] - x1u.shape[2]
    diffX = x2.shape[3] - x1u.shape[3]
    x1u = jnp.pad(x1u, ((0, 0), (0, 0),
                        (diffY // 2, diffY - diffY // 2),
                        (diffX // 2, diffX - diffX // 2)))
    x = jnp.concatenate([x2, x1u], axis=1)

    def conv_bn_relu(x, w, s, b):
        y = lax.conv_general_dilated(x, w, (1, 1), ((1, 1), (1, 1)),
                                     dimension_numbers=('NCHW', 'OIHW', 'NCHW'))
        y = y * s[None, :, None, None] + b[None, :, None, None]
        return jnp.maximum(y, 0.0)

    y = conv_bn_relu(x, params["w1"], params["s1"], params["b1"])
    y = conv_bn_relu(y, params["w2"], params["s2"], params["b2"])
    return y


# ----------------------------------------------------------------------------
def make_params(key, in_channels, out_channels):
    mid_channels = in_channels // 2
    c_skip = in_channels // 2          # channels of x2 in torch.cat([x2, x1])
    eps = 1e-5
    ks = jax.random.split(key, 10)

    w1 = jax.random.normal(ks[0], (mid_channels, in_channels, 3, 3), jnp.float32) * 0.2
    w2 = jax.random.normal(ks[1], (out_channels, mid_channels, 3, 3), jnp.float32) * 0.2

    g1 = 1.0 + 0.1 * jax.random.normal(ks[2], (mid_channels,), jnp.float32)
    be1 = 0.1 * jax.random.normal(ks[3], (mid_channels,), jnp.float32)
    m1 = 0.1 * jax.random.normal(ks[4], (mid_channels,), jnp.float32)
    v1 = 0.5 + jax.random.uniform(ks[5], (mid_channels,), jnp.float32)

    g2 = 1.0 + 0.1 * jax.random.normal(ks[6], (out_channels,), jnp.float32)
    be2 = 0.1 * jax.random.normal(ks[7], (out_channels,), jnp.float32)
    m2 = 0.1 * jax.random.normal(ks[8], (out_channels,), jnp.float32)
    v2 = 0.5 + jax.random.uniform(ks[9], (out_channels,), jnp.float32)

    s1 = g1 / jnp.sqrt(v1 + eps)
    b1 = be1 - m1 * s1
    s2 = g2 / jnp.sqrt(v2 + eps)
    b2 = be2 - m2 * s2

    # Kernel-side weights: fold the BN scale into the output channel, reorder
    # (O,I,ky,kx) -> (O,ky,kx,I) so the flattened contraction dim is tap-major /
    # channel-minor (matches the kernel's patch build), and split the input
    # channels at the concat boundary (x2 channels first, x1 channels second).
    w1_t = jnp.transpose(w1 * s1[:, None, None, None], (0, 2, 3, 1))  # (Cmid,3,3,Cin)
    w2_t = jnp.transpose(w2 * s2[:, None, None, None], (0, 2, 3, 1))  # (Cout,3,3,Cmid)
    w1a = w1_t[..., :c_skip].reshape(mid_channels, 9 * c_skip)
    w1b = w1_t[..., c_skip:].reshape(mid_channels, 9 * (in_channels - c_skip))
    w2s = w2_t.reshape(out_channels, 9 * mid_channels)

    return {"w1": w1, "w2": w2,
            "s1": s1, "b1": b1, "s2": s2, "b2": b2,
            "w1a": w1a, "w1b": w1b, "w2s": w2s,
            "b1c": b1.reshape(mid_channels, 1),
            "b2c": b2.reshape(out_channels, 1)}


if __name__ == "__main__":
    # Up(in_channels=8, out_channels=4, bilinear=True)
    # x1: deeper feature map (in_channels//2 = 4 ch, half spatial)
    # x2: skip connection   (in_channels//2 = 4 ch, full spatial)
    N, in_channels, out_channels = 2, 8, 4
    H2, W2 = 16, 16

    key = jax.random.PRNGKey(0)
    k_x1, k_x2, k_p = jax.random.split(key, 3)
    x1 = jax.random.normal(k_x1, (N, in_channels // 2, H2 // 2, W2 // 2), jnp.float32)
    x2 = jax.random.normal(k_x2, (N, in_channels // 2, H2, W2), jnp.float32)
    params = make_params(k_p, in_channels, out_channels)

    out = jax.block_until_ready(up_forward_pallas(x1, x2, params))
    ref = jax.block_until_ready(up_forward_ref(x1, x2, params))

    assert out.shape == (N, out_channels, H2, W2), out.shape
    if not jnp.allclose(out, ref, atol=1e-3, rtol=1e-3):
        max_err = float(jnp.max(jnp.abs(out - ref)))
        raise AssertionError(f"mismatch vs reference, max abs err = {max_err}")

    print("KERNEL_OK")
</pallas_src>

<mosaic_0001>
module attributes {stable_mosaic.version = 11 : i64} {
  func.func @_up_double_conv_kernel(%arg0: i32, %arg1: memref<1x4x320xf32, #tpu.memory_space<vmem>>, %arg2: memref<1x4x320xf32, #tpu.memory_space<vmem>>, %arg3: memref<4x36xf32, #tpu.memory_space<vmem>>, %arg4: memref<4x36xf32, #tpu.memory_space<vmem>>, %arg5: memref<4x1xf32, #tpu.memory_space<vmem>>, %arg6: memref<4x36xf32, #tpu.memory_space<vmem>>, %arg7: memref<4x1xf32, #tpu.memory_space<vmem>>, %arg8: memref<1x256xf32, #tpu.memory_space<vmem>>, %arg9: memref<1x256xf32, #tpu.memory_space<vmem>>, %arg10: memref<1x4x256xf32, #tpu.memory_space<vmem>>) attributes {dimension_semantics = [#tpu.dimension_semantics<parallel>], iteration_bounds = array<i64: 2>, scalar_prefetch = 0 : i64, scratch_operands = 0 : i64, tpu.core_type = #tpu.core_type<tc>, window_params = [{transform_indices = @transform_0, window_bounds = array<i64: 1, 4, 320>}, {transform_indices = @transform_1, window_bounds = array<i64: 1, 4, 320>}, {pipeline_mode = #tpu.pipeline_mode<synchronous>, transform_indices = @transform_2, window_bounds = array<i64: 4, 36>}, {pipeline_mode = #tpu.pipeline_mode<synchronous>, transform_indices = @transform_3, window_bounds = array<i64: 4, 36>}, {pipeline_mode = #tpu.pipeline_mode<synchronous>, transform_indices = @transform_4, window_bounds = array<i64: 4, 1>}, {pipeline_mode = #tpu.pipeline_mode<synchronous>, transform_indices = @transform_5, window_bounds = array<i64: 4, 36>}, {pipeline_mode = #tpu.pipeline_mode<synchronous>, transform_indices = @transform_6, window_bounds = array<i64: 4, 1>}, {pipeline_mode = #tpu.pipeline_mode<synchronous>, transform_indices = @transform_7, window_bounds = array<i64: 1, 256>}, {pipeline_mode = #tpu.pipeline_mode<synchronous>, transform_indices = @transform_8, window_bounds = array<i64: 1, 256>}, {transform_indices = @transform_9, window_bounds = array<i64: 1, 4, 256>}]} {
    %c0 = arith.constant 0 : index
    %c0_0 = arith.constant 0 : index
    %0 = vector.load %arg8[%c0, %c0_0] : memref<1x256xf32, #tpu.memory_space<vmem>>, vector<1x256xf32>
    %c0_1 = arith.constant 0 : index
    %c0_2 = arith.constant 0 : index
    %1 = vector.load %arg9[%c0_1, %c0_2] : memref<1x256xf32, #tpu.memory_space<vmem>>, vector<1x256xf32>
    %c0_3 = arith.constant 0 : index
    %c0_4 = arith.constant 0 : index
    %2 = vector.load %arg3[%c0_3, %c0_4] : memref<4x36xf32, #tpu.memory_space<vmem>>, vector<4x36xf32>
    %c0_5 = arith.constant 0 : index
    %c0_6 = arith.constant 0 : index
    %c0_7 = arith.constant 0 : index
    %3 = vector.load %arg1[%c0_5, %c0_6, %c0_7] : memref<1x4x320xf32, #tpu.memory_space<vmem>>, vector<1x4x320xf32>
    %4 = vector.shape_cast %3 : vector<1x4x320xf32> to vector<4x320xf32>
    %5 = vector.extract_strided_slice %4 {offsets = [0, 15], sizes = [4, 256], strides = [1, 1]} : vector<4x320xf32> to vector<4x256xf32>
    %6 = vector.broadcast %0 : vector<1x256xf32> to vector<4x256xf32>
    %7 = arith.mulf %5, %6 : vector<4x256xf32>
    %8 = vector.extract_strided_slice %4 {offsets = [0, 16], sizes = [4, 256], strides = [1, 1]} : vector<4x320xf32> to vector<4x256xf32>
    %9 = vector.extract_strided_slice %4 {offsets = [0, 17], sizes = [4, 256], strides = [1, 1]} : vector<4x320xf32> to vector<4x256xf32>
    %10 = vector.broadcast %1 : vector<1x256xf32> to vector<4x256xf32>
    %11 = arith.mulf %9, %10 : vector<4x256xf32>
    %12 = vector.extract_strided_slice %4 {offsets = [0, 31], sizes = [4, 256], strides = [1, 1]} : vector<4x320xf32> to vector<4x256xf32>
    %13 = vector.broadcast %0 : vector<1x256xf32> to vector<4x256xf32>
    %14 = arith.mulf %12, %13 : vector<4x256xf32>
    %15 = vector.extract_strided_slice %4 {offsets = [0, 32], sizes = [4, 256], strides = [1, 1]} : vector<4x320xf32> to vector<4x256xf32>
    %16 = vector.extract_strided_slice %4 {offsets = [0, 33], sizes = [4, 256], strides = [1, 1]} : vector<4x320xf32> to vector<4x256xf32>
    %17 = vector.broadcast %1 : vector<1x256xf32> to vector<4x256xf32>
    %18 = arith.mulf %16, %17 : vector<4x256xf32>
    %19 = vector.extract_strided_slice %4 {offsets = [0, 47], sizes = [4, 256], strides = [1, 1]} : vector<4x320xf32> to vector<4x256xf32>
    %20 = vector.broadcast %0 : vector<1x256xf32> to vector<4x256xf32>
    %21 = arith.mulf %19, %20 : vector<4x256xf32>
    %22 = vector.extract_strided_slice %4 {offsets = [0, 48], sizes = [4, 256], strides = [1, 1]} : vector<4x320xf32> to vector<4x256xf32>
    %23 = vector.extract_strided_slice %4 {offsets = [0, 49], sizes = [4, 256], strides = [1, 1]} : vector<4x320xf32> to vector<4x256xf32>
    %24 = vector.broadcast %1 : vector<1x256xf32> to vector<4x256xf32>
    %25 = arith.mulf %23, %24 : vector<4x256xf32>
    %26 = tpu.concatenate %7, %8, %11, %14, %15, %18, %21, %22, %25 in 0 : vector<4x256xf32>, vector<4x256xf32>, vector<4x256xf32>, vector<4x256xf32>, vector<4x256xf32>, vector<4x256xf32>, vector<4x256xf32>, vector<4x256xf32>, vector<4x256xf32> -> vector<36x256xf32>
    %cst = arith.constant dense<0.000000e+00> : vector<4x256xf32>
    %27 = tpu.matmul %2, %26, %cst {dimension_numbers = #tpu.dot_dimension_numbers<[1], [0], [0], [1], [0, 0, 1, 1], [], []>} : vector<4x36xf32>, vector<36x256xf32>, vector<4x256xf32> -> vector<4x256xf32>
    %c0_8 = arith.constant 0 : index
    %c0_9 = arith.constant 0 : index
    %28 = vector.load %arg4[%c0_8, %c0_9] : memref<4x36xf32, #tpu.memory_space<vmem>>, vector<4x36xf32>
    %c0_10 = arith.constant 0 : index
    %c0_11 = arith.constant 0 : index
    %c0_12 = arith.constant 0 : index
    %29 = vector.load %arg2[%c0_10, %c0_11, %c0_12] : memref<1x4x320xf32, #tpu.memory_space<vmem>>, vector<1x4x320xf32>
    %30 = vector.shape_cast %29 : vector<1x4x320xf32> to vector<4x320xf32>
    %31 = vector.extract_strided_slice %30 {offsets = [0, 15], sizes = [4, 256], strides = [1, 1]} : vector<4x320xf32> to vector<4x256xf32>
    %32 = vector.broadcast %0 : vector<1x256xf32> to vector<4x256xf32>
    %33 = arith.mulf %31, %32 : vector<4x256xf32>
    %34 = vector.extract_strided_slice %30 {offsets = [0, 16], sizes = [4, 256], strides = [1, 1]} : vector<4x320xf32> to vector<4x256xf32>
    %35 = vector.extract_strided_slice %30 {offsets = [0, 17], sizes = [4, 256], strides = [1, 1]} : vector<4x320xf32> to vector<4x256xf32>
    %36 = vector.broadcast %1 : vector<1x256xf32> to vector<4x256xf32>
    %37 = arith.mulf %35, %36 : vector<4x256xf32>
    %38 = vector.extract_strided_slice %30 {offsets = [0, 31], sizes = [4, 256], strides = [1, 1]} : vector<4x320xf32> to vector<4x256xf32>
    %39 = vector.broadcast %0 : vector<1x256xf32> to vector<4x256xf32>
    %40 = arith.mulf %38, %39 : vector<4x256xf32>
    %41 = vector.extract_strided_slice %30 {offsets = [0, 32], sizes = [4, 256], strides = [1, 1]} : vector<4x320xf32> to vector<4x256xf32>
    %42 = vector.extract_strided_slice %30 {offsets = [0, 33], sizes = [4, 256], strides = [1, 1]} : vector<4x320xf32> to vector<4x256xf32>
    %43 = vector.broadcast %1 : vector<1x256xf32> to vector<4x256xf32>
    %44 = arith.mulf %42, %43 : vector<4x256xf32>
    %45 = vector.extract_strided_slice %30 {offsets = [0, 47], sizes = [4, 256], strides = [1, 1]} : vector<4x320xf32> to vector<4x256xf32>
    %46 = vector.broadcast %0 : vector<1x256xf32> to vector<4x256xf32>
    %47 = arith.mulf %45, %46 : vector<4x256xf32>
    %48 = vector.extract_strided_slice %30 {offsets = [0, 48], sizes = [4, 256], strides = [1, 1]} : vector<4x320xf32> to vector<4x256xf32>
    %49 = vector.extract_strided_slice %30 {offsets = [0, 49], sizes = [4, 256], strides = [1, 1]} : vector<4x320xf32> to vector<4x256xf32>
    %50 = vector.broadcast %1 : vector<1x256xf32> to vector<4x256xf32>
    %51 = arith.mulf %49, %50 : vector<4x256xf32>
    %52 = tpu.concatenate %33, %34, %37, %40, %41, %44, %47, %48, %51 in 0 : vector<4x256xf32>, vector<4x256xf32>, vector<4x256xf32>, vector<4x256xf32>, vector<4x256xf32>, vector<4x256xf32>, vector<4x256xf32>, vector<4x256xf32>, vector<4x256xf32> -> vector<36x256xf32>
    %cst_13 = arith.constant dense<0.000000e+00> : vector<4x256xf32>
    %53 = tpu.matmul %28, %52, %cst_13 {dimension_numbers = #tpu.dot_dimension_numbers<[1], [0], [0], [1], [0, 0, 1, 1], [], []>} : vector<4x36xf32>, vector<36x256xf32>, vector<4x256xf32> -> vector<4x256xf32>
    %54 = arith.addf %27, %53 : vector<4x256xf32>
    %c0_14 = arith.constant 0 : index
    %c0_15 = arith.constant 0 : index
    %55 = vector.load %arg5[%c0_14, %c0_15] : memref<4x1xf32, #tpu.memory_space<vmem>>, vector<4x1xf32>
    %56 = vector.broadcast %55 : vector<4x1xf32> to vector<4x256xf32>
    %57 = arith.addf %54, %56 : vector<4x256xf32>
    %cst_16 = arith.constant 0.000000e+00 : f32
    %58 = vector.broadcast %cst_16 : f32 to vector<4x256xf32>
    %59 = arith.maximumf %57, %58 : vector<4x256xf32>
    %cst_17 = arith.constant 0.000000e+00 : f32
    %60 = vector.broadcast %cst_17 : f32 to vector<4x32xf32>
    %61 = tpu.concatenate %60, %59, %60 in 1 : vector<4x32xf32>, vector<4x256xf32>, vector<4x32xf32> -> vector<4x320xf32>
    %c0_18 = arith.constant 0 : index
    %c0_19 = arith.constant 0 : index
    %62 = vector.load %arg6[%c0_18, %c0_19] : memref<4x36xf32, #tpu.memory_space<vmem>>, vector<4x36xf32>
    %63 = vector.extract_strided_slice %61 {offsets = [0, 15], sizes = [4, 256], strides = [1, 1]} : vector<4x320xf32> to vector<4x256xf32>
    %64 = vector.broadcast %0 : vector<1x256xf32> to vector<4x256xf32>
    %65 = arith.mulf %63, %64 : vector<4x256xf32>
    %66 = vector.extract_strided_slice %61 {offsets = [0, 16], sizes = [4, 256], strides = [1, 1]} : vector<4x320xf32> to vector<4x256xf32>
    %67 = vector.extract_strided_slice %61 {offsets = [0, 17], sizes = [4, 256], strides = [1, 1]} : vector<4x320xf32> to vector<4x256xf32>
    %68 = vector.broadcast %1 : vector<1x256xf32> to vector<4x256xf32>
    %69 = arith.mulf %67, %68 : vector<4x256xf32>
    %70 = vector.extract_strided_slice %61 {offsets = [0, 31], sizes = [4, 256], strides = [1, 1]} : vector<4x320xf32> to vector<4x256xf32>
    %71 = vector.broadcast %0 : vector<1x256xf32> to vector<4x256xf32>
    %72 = arith.mulf %70, %71 : vector<4x256xf32>
    %73 = vector.extract_strided_slice %61 {offsets = [0, 32], sizes = [4, 256], strides = [1, 1]} : vector<4x320xf32> to vector<4x256xf32>
    %74 = vector.extract_strided_slice %61 {offsets = [0, 33], sizes = [4, 256], strides = [1, 1]} : vector<4x320xf32> to vector<4x256xf32>
    %75 = vector.broadcast %1 : vector<1x256xf32> to vector<4x256xf32>
    %76 = arith.mulf %74, %75 : vector<4x256xf32>
    %77 = vector.extract_strided_slice %61 {offsets = [0, 47], sizes = [4, 256], strides = [1, 1]} : vector<4x320xf32> to vector<4x256xf32>
    %78 = vector.broadcast %0 : vector<1x256xf32> to vector<4x256xf32>
    %79 = arith.mulf %77, %78 : vector<4x256xf32>
    %80 = vector.extract_strided_slice %61 {offsets = [0, 48], sizes = [4, 256], strides = [1, 1]} : vector<4x320xf32> to vector<4x256xf32>
    %81 = vector.extract_strided_slice %61 {offsets = [0, 49], sizes = [4, 256], strides = [1, 1]} : vector<4x320xf32> to vector<4x256xf32>
    %82 = vector.broadcast %1 : vector<1x256xf32> to vector<4x256xf32>
    %83 = arith.mulf %81, %82 : vector<4x256xf32>
    %84 = tpu.concatenate %65, %66, %69, %72, %73, %76, %79, %80, %83 in 0 : vector<4x256xf32>, vector<4x256xf32>, vector<4x256xf32>, vector<4x256xf32>, vector<4x256xf32>, vector<4x256xf32>, vector<4x256xf32>, vector<4x256xf32>, vector<4x256xf32> -> vector<36x256xf32>
    %cst_20 = arith.constant dense<0.000000e+00> : vector<4x256xf32>
    %85 = tpu.matmul %62, %84, %cst_20 {dimension_numbers = #tpu.dot_dimension_numbers<[1], [0], [0], [1], [0, 0, 1, 1], [], []>} : vector<4x36xf32>, vector<36x256xf32>, vector<4x256xf32> -> vector<4x256xf32>
    %c0_21 = arith.constant 0 : index
    %c0_22 = arith.constant 0 : index
    %86 = vector.load %arg7[%c0_21, %c0_22] : memref<4x1xf32, #tpu.memory_space<vmem>>, vector<4x1xf32>
    %87 = vector.broadcast %86 : vector<4x1xf32> to vector<4x256xf32>
    %88 = arith.addf %85, %87 : vector<4x256xf32>
    %cst_23 = arith.constant 0.000000e+00 : f32
    %89 = vector.broadcast %cst_23 : f32 to vector<4x256xf32>
    %90 = arith.maximumf %88, %89 : vector<4x256xf32>
    %c0_24 = arith.constant 0 : index
    %c0_25 = arith.constant 0 : index
    %c0_26 = arith.constant 0 : index
    %91 = vector.load %arg10[%c0_24, %c0_25, %c0_26] : memref<1x4x256xf32, #tpu.memory_space<vmem>>, vector<1x4x256xf32>
    %92 = vector.shape_cast %91 : vector<1x4x256xf32> to vector<4x256xf32>
    %93 = vector.shape_cast %90 : vector<4x256xf32> to vector<1x4x256xf32>
    tpu.vector_store %arg10[%c0_24, %c0_25, %c0_26], %93 {strides = array<i32>} : memref<1x4x256xf32, #tpu.memory_space<vmem>>, vector<1x4x256xf32>,
    return
  }
  func.func @transform_0(%arg0: i32) -> (i32, i32, i32) {
    %c0_i32 = arith.constant 0 : i32
    %c0_i32_0 = arith.constant 0 : i32
    %c0_i32_1 = arith.constant 0 : i32
    return %arg0, %c0_i32, %c0_i32_0 : i32, i32, i32
  }
  func.func @transform_1(%arg0: i32) -> (i32, i32, i32) {
    %c0_i32 = arith.constant 0 : i32
    %c0_i32_0 = arith.constant 0 : i32
    %c0_i32_1 = arith.constant 0 : i32
    return %arg0, %c0_i32, %c0_i32_0 : i32, i32, i32
  }
  func.func @transform_2(%arg0: i32) -> (i32, i32) {
    %c0_i32 = arith.constant 0 : i32
    %c0_i32_0 = arith.constant 0 : i32
    %c0_i32_1 = arith.constant 0 : i32
    return %c0_i32, %c0_i32_0 : i32, i32
  }
  func.func @transform_3(%arg0: i32) -> (i32, i32) {
    %c0_i32 = arith.constant 0 : i32
    %c0_i32_0 = arith.constant 0 : i32
    %c0_i32_1 = arith.constant 0 : i32
    return %c0_i32, %c0_i32_0 : i32, i32
  }
  func.func @transform_4(%arg0: i32) -> (i32, i32) {
    %c0_i32 = arith.constant 0 : i32
    %c0_i32_0 = arith.constant 0 : i32
    %c0_i32_1 = arith.constant 0 : i32
    return %c0_i32, %c0_i32_0 : i32, i32
  }
  func.func @transform_5(%arg0: i32) -> (i32, i32) {
    %c0_i32 = arith.constant 0 : i32
    %c0_i32_0 = arith.constant 0 : i32
    %c0_i32_1 = arith.constant 0 : i32
    return %c0_i32, %c0_i32_0 : i32, i32
  }
  func.func @transform_6(%arg0: i32) -> (i32, i32) {
    %c0_i32 = arith.constant 0 : i32
    %c0_i32_0 = arith.constant 0 : i32
    %c0_i32_1 = arith.constant 0 : i32
    return %c0_i32, %c0_i32_0 : i32, i32
  }
  func.func @transform_7(%arg0: i32) -> (i32, i32) {
    %c0_i32 = arith.constant 0 : i32
    %c0_i32_0 = arith.constant 0 : i32
    %c0_i32_1 = arith.constant 0 : i32
    return %c0_i32, %c0_i32_0 : i32, i32
  }
  func.func @transform_8(%arg0: i32) -> (i32, i32) {
    %c0_i32 = arith.constant 0 : i32
    %c0_i32_0 = arith.constant 0 : i32
    %c0_i32_1 = arith.constant 0 : i32
    return %c0_i32, %c0_i32_0 : i32, i32
  }
  func.func @transform_9(%arg0: i32) -> (i32, i32, i32) {
    %c0_i32 = arith.constant 0 : i32
    %c0_i32_0 = arith.constant 0 : i32
    %c0_i32_1 = arith.constant 0 : i32
    return %arg0, %c0_i32, %c0_i32_0 : i32, i32, i32
  }
}

</mosaic_0001>

<bundles_post_ra>
// kernel: tpu_custom_call.1
= control target key start
LH: loop header
LB: loop body
LE: loop exit
PB: predicated region body
PF: predicated region fallthrough
CT: control target
= control target key end

     0   :  { %s2716_s0 = inlined_call_operand.hbm [shape: f32[2,4,320], index: 0, kind: input, shape index: {}]   ;;  %s2717_s1 = inlined_call_operand.hbm [shape: f32[2,4,320], index: 1, kind: input, shape index: {}]   ;;  %s2718_s2 = inlined_call_operand.vmem [shape: f32[4,36], index: 2, kind: input, shape index: {}]   ;;  %s2719_s3 = inlined_call_operand.vmem [shape: f32[4,36], index: 3, kind: input, shape index: {}]   ;;  %s2720_s4 = inlined_call_operand.vmem [shape: f32[4,1], index: 4, kind: input, shape index: {}]   ;;  %s2721_s5 = inlined_call_operand.vmem [shape: f32[4,36], index: 5, kind: input, shape index: {}]   ;;  %s2722_s6 = inlined_call_operand.vmem [shape: f32[4,1], index: 6, kind: input, shape index: {}]   ;;  %s2723_s7 = inlined_call_operand.vmem [shape: f32[1,256], index: 7, kind: input, shape index: {}]   ;;  %s2724_s8 = inlined_call_operand.vmem [shape: f32[1,256], index: 8, kind: input, shape index: {}]   ;;  %s2725_s9 = inlined_call_operand.hbm [shape: f32[2,4,256], index: 9, kind: output, shape index: {}]  }
   0x1   :  { %2738 = sst [smem:[#allocation13_spill]] %s2716_s0 }
   0x2   :  { %14 = vsyncpa [#allocation3], 0 }
   0x3   :  { %16 = vsyncpa [#allocation3 + $0x1], 0 }
   0x4   :  { %17 = vsyncpa [#allocation6], 0 }
   0x5   :  { %19 = vsyncpa [#allocation6 + $0x1], 0 }
   0x6   :  { %20 = vsyncpa [#allocation4], 0 }
   0x7   :  { %22 = vsyncpa [#allocation4 + $0x1], 0  ;;  %s2047_s30 = smov 0   ;;  %s2049_s10 = smov 0  }
   0x8   :  { %s2051_s11 = smov 0   ;;  %s2053_s12 = smov 0  }
   0x9 LB: > { %2739 = sst [smem:[#allocation11_spill]] %s1970_s11  ;;  %s2068_s13 = sadd.s32 4294967295, %s1974_s12   ;;  %s1974_s12 = sphi %s2053_s12, %s2765_s12   ;;  %s1970_s11 = sphi %s2051_s11, %s2762_s11   ;;  %s1966_s10 = sphi %s2049_s10, %s2764_s10   ;;  %s1962_s30 = sphi %s2047_s30, %s2763_s30  }
   0xa   : > { %s1484_s14 = sadd.s32 4294967294, %s1974_s12   ;;  %s2072_s15 = sadd.s32 1, %s1974_s12  }
   0xb   : > { %s35_s16 = sadd.s32 1, %s1970_s11  ;;  %s32_s17 = ssub.s32 %s1974_s12, %s2072_s15 }
   0xc   : > { %p42_p0 = scmp.ne.s32.totalorder %s1970_s11, %s1966_s10  ;;  %p33_p1 = scmp.eq.s32.totalorder %s32_s17, 0 }
   0xd   : > { %p43_p2 = scmp.eq.s32.totalorder %s1974_s12, 0  ;;  %p48_p3 = scmp.ne.s32.totalorder %s1966_s10, %s1962_s30 }
   0xe   : > { %p49_p4 = scmp.eq.s32.totalorder %s2068_s13, 0  ;;  %p245_p7 = scmp.eq.s32.totalorder %s2068_s13, 1 }
   0xf   : > { %s2084_s18 = scalar_select %p33_p1, %s1970_s11, %s35_s16  }
  0x10   : > { %p44_p5 = por %p43_p2, %p42_p0  ;;  %p2086_p6 = por %p49_p4, %p48_p3 }
  0x11   : > { %2740 = sst [smem:[#allocation12_spill]] %s2084_s18  ;;  %p251_p8 = scmp.eq.s32.totalorder %s1484_s14, 1 }
  0x12   : > { %s2741_s19 = scalar_select %p2086_p6, 1, 0 }
  0x13   : > { %p1554_p10 = scmp.lt.s32.totalorder %s1974_s12, 2  ;;  %p2093_p11 = por %p245_p7, %p42_p0 }
  0x14   : > { %p2097_p12 = por %p251_p8, %p48_p3  ;;  %s2102_s22 = sand.u32 1, %s1970_s11  }
  0x15   : > { %s2742_s20 = scalar_select %p2093_p11, 1, 0 }
  0x16   : > { %s2743_s21 = scalar_select %p2097_p12, 1, 0 }
  0x17   : > { %s2726_s23 = smul.u32 192, %s1974_s12  ;;  %s2744_s0 = sld [smem:[#allocation13_spill]] }
  0x18   : > { %s1532_s24 = smul.u32 12, %s2102_s22  ;;  %p2113_p13 = pnand %p1554_p10, %p44_p5 }
  0x19   : > { %s293_s16 = scalar_lea.sflag [#allocation3], %s2102_s22 }
  0x1a   : > { %s296_s29 = scalar_lea.vmem [#allocation2], %s1532_s24  ;;  %p1846_p3 = pneg %p2113_p13 }
  0x1b   : > { %s304_s14 = sshll.u32 %s296_s29, 4  ;;  %s2120_s14 = int_to_ptr.vmem [resolvable:$true] %s304_s14 }
  0x1d   : > { %s2111_s27 = scalar_lea.hbm %s2744_s0, %s2726_s23  ;;  %s1849_s23 = scalar_lea.hbm %s2744_s0, 384 }
  0x1e   : > { %s1844_s17 = scalar_lea.hbm %s2111_s27, 192  ;;  %p1850_p7 = scmp.lt.u32.totalorder %s2111_s27, %s2744_s0 }
  0x1f   : > { %p1845_p2 = scmp.ne.s32.totalorder %s2111_s27, %s1844_s17  ;;  %p1851_p8 = scmp.lt.u32.totalorder %s1849_s23, %s1844_s17 }
  0x20   : > { %p1853_p9 = scmp.lt.u32.totalorder %s1844_s17, %s2111_s27 }
  0x21   : > { %p1847_p4 = pnand %p1846_p3, %p1845_p2  ;;  %p1852_p10 = por %p1851_p8, %p1850_p7 }
  0x23   : > { %p1848_p5 = pneg %p1847_p4  ;;  %p1854_p0 = por %p1853_p9, %p1852_p10 }
  0x25   : > { %p1855_p1 = pnand %p1854_p0, %p1848_p5 }
  0x27   : > { %1858 = shalt.err (!%p1855_p1)
}
  0x28   : > { %s1859_s29 = scalar_lea.vmem %s2120_s14, 192  ;;  %s1976_s25 = smov [#allocation2]  }
  0x29   : > { %p1860_p2 = scmp.ne.s32.totalorder %s2120_s14, %s1859_s29  ;;  %s1864_s26 = sshll.u32 %s1976_s25, 4  ;;  %s1865_s26 = int_to_ptr.vmem [resolvable:$false] %s1864_s26 }
  0x2a   : > { %s1866_s11 = scalar_lea.vmem %s1865_s26, 384  ;;  %p1867_p11 = scmp.lt.s32.totalorder %s2120_s14, %s1865_s26 }
  0x2b   : > { %p1862_p4 = pnand %p1860_p2, %p1846_p3  ;;  %p1868_p7 = scmp.lt.s32.totalorder %s1866_s11, %s1859_s29 }
  0x2d   : > { %p1863_p12 = pneg %p1862_p4  ;;  %p1869_p8 = por %p1868_p7, %p1867_p11 }
  0x2f   : > { %p1870_p9 = pnand %p1869_p8, %p1863_p12 }
  0x31   : > { %1873 = shalt.err (!%p1870_p9)
}
  0x32   : > { %1546 = dma.hbm_to_vmem [thread:$0]  (!%p2113_p13), %s2111_s27, 192, %s2120_s14, %s293_s16  }
  0x33   : > { %p2746_p0 = scmp.lt.s32.totalorder %s1974_s12, 3  ;;  %p2747_p1 = scmp.ge.s32.totalorder %s1974_s12, 1 }
  0x34   : > { %s2749_s23 = smul.u32 192, %s1974_s12  ;;  %s315_s26 = scalar_lea.vmem [#allocation5], %s1532_s24 }
  0x35   : > { %p2153_p5 = pnand %p2747_p1, %p2746_p0  ;;  %s323_s11 = sshll.u32 %s315_s26, 4  ;;  %s324_s11 = int_to_ptr.vmem [resolvable:$true] %s323_s11 }
  0x36   : > { %s2162_s25 = scalar_lea.hbm %s2717_s1, %s2749_s23  ;;  %s312_s27 = scalar_lea.sflag [#allocation6], %s2102_s22 }
  0x37   : > { %s2748_s18 = scalar_select %p2153_p5, 1, 0 }
  0x38   : > { %s1874_s14 = scalar_lea.hbm %s2162_s25, 192  ;;  %s1879_s23 = scalar_lea.hbm %s2717_s1, 384 }
  0x39   : > { %p1875_p11 = scmp.ne.s32.totalorder %s2162_s25, %s1874_s14  ;;  %p1880_p2 = scmp.lt.u32.totalorder %s2162_s25, %s2717_s1 }
  0x3a   : > { %p1881_p4 = scmp.lt.u32.totalorder %s1879_s23, %s1874_s14  ;;  %p1883_p8 = scmp.lt.u32.totalorder %s1874_s14, %s2162_s25 }
  0x3b   : > { %p1877_p12 = pnand %p1875_p11, %p1846_p3 }
  0x3c   : > { %p1882_p7 = por %p1881_p4, %p1880_p2 }
  0x3d   : > { %p1878_p10 = pneg %p1877_p12 }
  0x3e   : > { %p1884_p9 = por %p1883_p8, %p1882_p7 }
  0x40   : > { %p1885_p0 = pnand %p1884_p9, %p1878_p10 }
  0x42   : > { %1888 = shalt.err (!%p1885_p0)
}
  0x43   : > { %s1889_s22 = scalar_lea.vmem %s324_s11, 192  ;;  %s1977_s24 = smov [#allocation5]  }
  0x44   : > { %p1890_p1 = scmp.ne.s32.totalorder %s324_s11, %s1889_s22  ;;  %s1894_s0 = sshll.u32 %s1977_s24, 4  ;;  %s1895_s0 = int_to_ptr.vmem [resolvable:$false] %s1894_s0 }
  0x45   : > { %s1896_s26 = scalar_lea.vmem %s1895_s0, 384  ;;  %p1897_p6 = scmp.lt.s32.totalorder %s324_s11, %s1895_s0 }
  0x46   : > { %p1892_p11 = pnand %p1890_p1, %p1846_p3  ;;  %p1898_p5 = scmp.lt.s32.totalorder %s1896_s26, %s1889_s22 }
  0x48   : > { %p1893_p12 = pneg %p1892_p11  ;;  %p1899_p2 = por %p1898_p5, %p1897_p6 }
  0x4a   : > { %p1900_p4 = pnand %p1899_p2, %p1893_p12 }
  0x4c   : > { %1903 = shalt.err (!%p1900_p4)
}
  0x4d   : > { %1549 = dma.hbm_to_vmem [thread:$0]  (!%p2113_p13), %s2162_s25, 192, %s324_s11, %s312_s27  }
  0x4e   : > { %p2750_p10 = scmp.ne.s32.totalorder %s2748_s18, 0 }
  0x4f   : > { %s2189_s14 = sand.u32 (!%p2750_p10), 1, %s1966_s10   ;;  %p2751_p6 = scmp.ne.s32.totalorder (!%p2750_p10), %s2741_s19, 0 }
  0x50   : > { %332 = sbr.rel (%p2750_p10) target bundleno = 1348 (0x544), region = 56  ;;  %s335_s23 = scalar_lea.sflag (!%p2750_p10), [#allocation3], %s2189_s14 }
  0x51   : > { %s1536_s16 = smul.u32 (!%p2750_p10), 12, %s2189_s14 }
  0x53   : > { %s2193_s17 = scalar_lea.vmem (!%p2750_p10), [#allocation2], %s1536_s16 }
  0x57   : > { %1949 = dma.done.wait (%p2751_p6), %s335_s23, 192  }
  0x58   : > { %1951 = vsyncadd (%p2751_p6), %s335_s23, 4294967104  ;;  %s344_s28 = scalar_lea.sflag [#allocation6], %s2189_s14  ;;  %s347_s18 = scalar_lea.vmem [#allocation5], %s1536_s16 }
  0x59   : > { %1953 = dma.done.wait (%p2751_p6), %s344_s28, 192  }
  0x5a   : > { %1955 = vsyncadd (%p2751_p6), %s344_s28, 4294967104  ;;  %v393_v0 = vlaneseq  ;;  %v388_v4 = vld [vmem:[%s2724_s8] sm:$0x3]  ;;  %v2218_v10 = vld [vmem:[%s347_s18] sm:$0xff]  ;;  %s1978_s19 = smov 17   ;;  %s1979_s22 = smov 47  }
  0x5b   : > { %v387_v5 = vld [vmem:[%s2723_s7] sm:$0x3]  ;;  %v617_v13 = vcombine.low %v2218_v10, %v2218_v10  ;;  %s1980_s24 = smov 31   ;;  %s1981_s0 = smov 33   ;;  %v659_v19 = vcombine.high %v2218_v10, %v2218_v10  ;;  %v2249_v22 = vld [vmem:[%s2193_s17 + $0x8] sm:$0xf] }
  0x5c   : > { %v394_v1 = vshrl.u32 %v393_v0, 7  ;;  %v2229_v14 = vld [vmem:[%s2193_s17] sm:$0xff]  ;;  %s1982_s26 = smov 49   ;;  %s1983_s16 = smov 127   ;;  %v472_v25 = vcombine.low %v2249_v22, %v2249_v22  ;;  %vm424_vm0 = vcmask 138240   ;;  %vm433_vm1 = vcmask 252928  }
  0x5d   : > { %v2231_v15 = vld [vmem:[%s347_s18 + $0x8] sm:$0xf]  ;;  %v1611_v16 = vpack.i.bf16 %v2229_v14, %v617_v13  ;;  %s1984_s23 = smov 15   ;;  %v516_v21 = vcombine.high %v2229_v14, %v2229_v14  ;;  %v471_v23 = vcombine.low %v2229_v14, %v2229_v14  ;;  %s1985_s28 = smov 111   ;;  %vm451_vm2 = vcmask 384000  }
  0x5e   : > { %v395_v2 = vsub.s32 0, %v394_v1  ;;  %v399_v3 = vsub.s32 1, %v394_v1  ;;  %v618_v17 = vcombine.low %v2231_v15, %v2231_v15  ;;  %v1616_v20 = vpack.i.bf16 %v2231_v15, %v659_v19  ;;  %s1986_s18 = smov 95   ;;  %s1987_s17 = smov 126  }
  0x5f   : > { %v1626_v24 = vpack.i.bf16 %v516_v21, %v2218_v10  ;;  %v2259_v26 = vpack.i.bf16 %v471_v23, %v472_v25  ;;  %vm460_vm3 = vcmask 400384   ;;  %vm442_vm4 = vcmask 269312   ;;  %s2732_s25 = smov 94   ;;  %s1989_s11 = smov 112  }
  0x60   : > { %v2210_v6 = vrot.slane %v388_v4, %v395_v2  ;;  %v2212_v7 = vrot.slane %v388_v4, %v399_v3  ;;  %v2214_v8 = vrot.slane %v387_v5, %v395_v2  ;;  %v2216_v9 = vrot.slane %v387_v5, %v399_v3  ;;  %s2730_s27 = smov 110   ;;  %s2734_s29 = smov 96  }
  0x61   : > { %v1606_v18 = vpack.i.bf16 %v618_v17, %v2218_v10  ;;  %vm479_vm5 = vcmask 1039360   ;;  %vm405_vm6 = vcmask 121856   ;;  %vm523_vm7 = vcmask 908288   ;;  %p2758_p3 = scmp.ne.s32.totalorder %s2742_s20, 0 }
  0x62   : > { %v420_v11 = vcombine.low %v2210_v6, %v2212_v7  ;;  %v401_v12 = vcombine.low %v2214_v8, %v2216_v9  ;;  %vm584_vm8 = vcmask 1043456   ;;  %vm539_vm9 = vcmask 900096  }
  0x63   : > { %vm510_vm10 = vcmask 916480   ;;  %vm494_vm11 = vcmask 1031168   ;;  %vm566_vm12 = vcmask 777216   ;;  %vm554_vm13 = vcmask 785408  }
  0x64   : > { %421 = vrot.lane.b32.xlu0 %v420_v11, %s1978_s19  ;;  %448 = vrot.lane.b32.xlu1 %v401_v12, %s1979_s22  ;;  %vm2736_vm14 = vcmask 769024   ;;  %vm776_vm15 = vcmask 924672  }
  0x68   : > { %430 = vrot.lane.b32.xlu0 %v401_v12, %s1980_s24  ;;  %439 = vrot.lane.b32.xlu1 %v420_v11, %s1981_s0 }
  0x6c   : > { %457 = vrot.lane.b32.xlu0 %v420_v11, %s1982_s26  ;;  %1612 = vrot.lane.b32.xlu1 %v1611_v16, %s1983_s16 }
  0x70   : > { %1607 = vrot.lane.b32.xlu0 %v1606_v18, %s1983_s16  ;;  %402 = vrot.lane.b32.xlu1 %v401_v12, %s1984_s23 }
  0x74   : > { %1617 = vrot.lane.b32.xlu0 %v1616_v20, %s1985_s28  ;;  %1622 = vrot.lane.b32.xlu1 %v1606_v18, %s1986_s18 }
  0x78   : > { %1627 = vrot.lane.b32.xlu0 %v1626_v24, %s1985_s28  ;;  %1632 = vrot.lane.b32.xlu1 %v1611_v16, %s1986_s18 }
  0x7c   : > { %1637 = vrot.lane.b32.xlu0 %v2259_v26, %s1983_s16 }
  0xd6   : > { %v422_v27 = vpop.permute.xlu0 %421  ;;  %v449_v28 = vpop.permute.xlu1 %448 }
  0xd7   : > { %v423_v29 = vrot.slane %v422_v27, 4  ;;  %v2271_v37 = vrot.slane %v449_v28, 4 }
  0xd9   : > { %v425_v30 = vsel %vm424_vm0, %v423_v29, %v422_v27  ;;  %v429_v36 = vmul.f32 %v423_v29, %v2249_v22  ;;  %v452_v45 = vsel %vm451_vm2, %v2271_v37, %v449_v28  ;;  %v603_v4 = vmul.f32 %v2231_v15, %v423_v29 }
  0xda   : > { %v431_v31 = vpop.permute.xlu0 %430  ;;  %v440_v32 = vpop.permute.xlu1 %439  ;;  %v428_v33 = vmul.f32 %v425_v30, %v2229_v14  ;;  %v602_v53 = vmul.f32 %v2218_v10, %v425_v30  ;;  %v608_v55 = vmul.f32 %v2218_v10, %v452_v45  ;;  %v455_v2 = vmul.f32 %v452_v45, %v2229_v14 }
  0xdb   : > { %v2266_v34 = vrot.slane %v431_v31, 4  ;;  %v2268_v35 = vrot.slane %v440_v32, 4  ;;  %v609_v5 = vmul.f32 %v2231_v15, %v2271_v37  ;;  %v1686_v45 = vpack.i.bf16 %v2229_v14, %v2249_v22 }
  0xdc   : > { %v1641_v43 = vpack.i.bf16 %v428_v33, %v429_v36  ;;  %v487_v57 = vcombine.high %v428_v33, %v428_v33  ;;  %v632_v62 = vcombine.high %v602_v53, %v602_v53  ;;  %v688_v3 = vcombine.high %v608_v55, %v608_v55 }
  0xdd   : > { %v605_v38 = vmul.f32 %v2231_v15, %v2266_v34  ;;  %v434_v39 = vsel %vm433_vm1, %v2266_v34, %v431_v31  ;;  %v607_v42 = vmul.f32 %v2231_v15, %v2268_v35  ;;  %v443_v50 = vsel %vm442_vm4, %v2268_v35, %v440_v32 }
  0xde   : > { %v458_v40 = vpop.permute.xlu0 %457  ;;  %v2277_v41 = vpop.permute.xlu1 %1612  ;;  %v604_v46 = vmul.f32 %v2218_v10, %v434_v39  ;;  %1642 = vrot.lane.b32.xlu1 %v1641_v43, %s1987_s17  ;;  %v606_v58 = vmul.f32 %v2218_v10, %v443_v50  ;;  %v1661_v11 = vpack.i.bf16 %v487_v57, %v602_v53  ;;  %v1656_v19 = vpack.i.bf16 %v603_v4, %v632_v62 }
  0xdf   : > { %v2281_v44 = vrot.slane %v458_v40, 4  ;;  %v647_v49 = vcombine.low %v605_v38, %v605_v38  ;;  %v674_v54 = vcombine.low %v607_v42, %v607_v42  ;;  %v1614_v60 = vunpack.i.l.bf16 %v2277_v41 }
  0xe0   : > { %v646_v18 = vcombine.low %v604_v46, %v604_v46  ;;  %v547_v21 = vcombine.high %v455_v2, %v455_v2  ;;  %v437_v24 = vmul.f32 %v434_v39, %v2229_v14  ;;  %v1671_v25 = vpack.i.bf16 %v609_v5, %v688_v3 }
  0xe1   : > { %v2289_v47 = vsel %vm460_vm3, %v2281_v44, %v458_v40  ;;  %v611_v48 = vmul.f32 %v2231_v15, %v2281_v44  ;;  %v1646_v59 = vpack.i.bf16 %v647_v49, %v604_v46  ;;  %v1651_v63 = vpack.i.bf16 %v674_v54, %v606_v58 }
  0xe2   : > { %v2297_v51 = vmul.f32 %v2218_v10, %v2289_v47  ;;  %v2299_v52 = vpop.permute.xlu0 %1607  ;;  %v403_v56 = vpop.permute.xlu1 %402  ;;  %v1615_v27 = vunpack.i.h.bf16 %v2277_v41  ;;  %v446_v31 = vmul.f32 %v443_v50, %v2229_v14  ;;  %v1666_v32 = vpack.i.bf16 %v437_v24, %v646_v18 }
  0xe3   : > { %718 = vrot.lane.b32.xlu0 %v611_v48, %s2732_s25  ;;  %v1609_v0 = vunpack.i.l.bf16 %v2299_v52  ;;  %v2312_v1 = vrot.slane %v403_v56, 4  ;;  %v438_v38 = vmul.f32 %v2266_v34, %v2249_v22  ;;  %v1681_v39 = vpack.i.bf16 %v547_v21, %v608_v55 }
  0xe4   : > { %714 = vrot.lane.b32.xlu1 %v2297_v51, %s2732_s25  ;;  %v447_v42 = vmul.f32 %v2268_v35, %v2249_v22  ;;  %v502_v46 = vcombine.low %v437_v24, %v437_v24  ;;  %v531_v48 = vcombine.low %v446_v31, %v446_v31  ;;  %v713_v49 = vcombine.high %v2297_v51, %v2297_v51 }
  0xe5   : > { %v625_v12 = vsel %vm479_vm5, %v1614_v60, %v1609_v0  ;;  %v406_v13 = vsel %vm405_vm6, %v2312_v1, %v403_v56  ;;  %v503_v34 = vcombine.low %v438_v38, %v438_v38  ;;  %v456_v53 = vmul.f32 %v2271_v37, %v2249_v22 }
  0xe6   : > { %v2308_v61 = vpop.permute.xlu0 %1617  ;;  %v600_v23 = vmul.f32 %v2218_v10, %v406_v13  ;;  %v673_v10 = vcombine.low %v606_v58, %v606_v58  ;;  %v409_v36 = vmul.f32 %v406_v13, %v2229_v14  ;;  %v532_v50 = vcombine.low %v447_v42, %v447_v42  ;;  %v2390_v3 = vpop.permute.xlu1 %1622 }
  0xe7   : > { %1647 = vrot.lane.b32.xlu0 %v1646_v59, %s1989_s11  ;;  %v1619_v16 = vunpack.i.l.bf16 %v2308_v61  ;;  %v1691_v35 = vpack.i.bf16 %v502_v46, %v503_v34  ;;  %v1610_v55 = vunpack.i.h.bf16 %v2299_v52  ;;  %v464_v56 = vmul.f32 %v2289_v47, %v2229_v14 }
  0xe8   : > { %1652 = vrot.lane.b32.xlu1 %v1651_v63, %s2730_s27  ;;  %v2339_v30 = vsel %vm584_vm8, %v600_v23, %v625_v12  ;;  %v1676_v43 = vpack.i.bf16 %v446_v31, %v673_v10  ;;  %v1701_v54 = vpack.i.bf16 %v531_v48, %v532_v50  ;;  %v1696_v57 = vpack.i.bf16 %v455_v2, %v456_v53 }
  0xe9   : > { %v601_v51 = vmul.f32 %v2231_v15, %v2312_v1  ;;  %v613_v58 = vcombine.high %v600_v23, %v600_v23  ;;  %v626_v37 = vsel %vm479_vm5, %v1609_v0, %v1610_v55  ;;  %v574_v60 = vcombine.high %v464_v56, %v464_v56 }
  0xea   : > { %v2325_v17 = vpop.permute.xlu0 %1627  ;;  %v410_v14 = vmul.f32 %v2312_v1, %v2249_v22  ;;  %v467_v47 = vcombine.high %v409_v36, %v409_v36  ;;  %v465_v52 = vmul.f32 %v2281_v44, %v2249_v22  ;;  %v2392_v22 = vpop.permute.xlu1 %1632  ;;  %v1624_v42 = vunpack.i.l.bf16 %v2390_v3 }
  0xeb   : > { %1662 = vrot.lane.b32.xlu0 %v1661_v11, %s1987_s17  ;;  %v1629_v20 = vunpack.i.l.bf16 %v2325_v17  ;;  %v723_v62 = vsel %vm584_vm8, %v613_v58, %v626_v37  ;;  %v724_v15 = vsel %vm584_vm8, %v601_v51, %v1610_v55  ;;  %v1620_v11 = vunpack.i.h.bf16 %v2308_v61 }
  0xec   : > { %1657 = vrot.lane.b32.xlu1 %v1656_v19, %s1987_s17  ;;  %v1711_v0 = vpack.i.bf16 %v724_v15, %v723_v62 }
  0xed   : > { %v2336_v28 = vsel %vm523_vm7, %v1629_v20, %v1619_v16  ;;  %v667_v20 = vsel %vm523_vm7, %v1619_v16, %v1620_v11 }
  0xee   : > { %v1638_v29 = vpop.permute.xlu0 %1637 }
  0xef   : > { %1672 = vrot.lane.b32.xlu0 %v1671_v25, %s2734_s29  ;;  %v1640_v33 = vunpack.i.h.bf16 %v1638_v29  ;;  %v1639_v59 = vunpack.i.l.bf16 %v1638_v29 }
  0xf0   : > { %1667 = vrot.lane.b32.xlu1 %v1666_v32, %s1989_s11 }
  0xf1   : > { %v480_v40 = vsel %vm479_vm5, %v1640_v33, %v1615_v27  ;;  %v481_v63 = vsel %vm479_vm5, %v1615_v27, %v1639_v59  ;;  %v587_v2 = vsel %vm584_vm8, %v410_v14, %v1639_v59  ;;  %v1625_v59 = vunpack.i.h.bf16 %v2390_v3 }
  0xf2   : > { %v2349_v41 = vsel %vm584_vm8, %v409_v36, %v480_v40 }
  0xf3   : > { %1682 = vrot.lane.b32.xlu0 %v1681_v39, %s2734_s29 }
  0xf4   : > { %1677 = vrot.lane.b32.xlu1 %v1676_v43, %s2730_s27  ;;  %v1634_v43 = vunpack.i.l.bf16 %v2392_v22 }
  0xf6   : > { %v706_v53 = vsel %vm566_vm12, %v1634_v43, %v1624_v42 }
  0xf7   : > { %1687 = vrot.lane.b32.xlu0 %v1686_v45, %s1985_s28 }
  0xf8   : > { %716 = vrot.lane.b32.xlu1 %v713_v49, %s2732_s25 }
  0xfb   : > { %1692 = vrot.lane.b32.xlu0 %v1691_v35, %s1989_s11 }
  0xfc   : > { %1702 = vrot.lane.b32.xlu1 %v1701_v54, %s2730_s27  ;;  %s1992_s27 = smov 113  }
  0xff   : > { %1697 = vrot.lane.b32.xlu0 %v1696_v57, %s2734_s29 }
 0x100   : > { %1707 = vrot.lane.b32.xlu1 %v2259_v26, %s1986_s18  ;;  %v586_v26 = vsel %vm584_vm8, %v467_v47, %v481_v63 }
 0x101   : > { %v1716_v1 = vpack.i.bf16 %v587_v2, %v586_v26 }
 0x103   : > { %577 = vrot.lane.b32.xlu0 %v574_v60, %s2732_s25 }
 0x104   : > { %579 = vrot.lane.b32.xlu1 %v465_v52, %s2732_s25 }
 0x107   : > { %575 = vrot.lane.b32.xlu0 %v464_v56, %s2732_s25 }
 0x108   : > { %1712 = vrot.lane.b32.xlu1 %v1711_v0, %s1992_s27 }
 0x10c   : > { %1717 = vrot.lane.b32.xlu1 %v1716_v1, %s1992_s27 }
 0x150   : > { %v2394_v44 = vpop.permute.xlu1 %1642 }
 0x151   : > { %v1644_v0 = vunpack.i.l.bf16 %v2394_v44 }
 0x155   : > { %v719_v4 = vpop.permute.xlu0 %718 }
 0x156   : > { %774 = vrot.lane.b32.xlu0 %v719_v4, %s1992_s27  ;;  %v2397_v5 = vpop.permute.xlu1 %714 }
 0x159   : > { %v1648_v12 = vpop.permute.xlu0 %1647 }
 0x15a   : > { %v1653_v13 = vpop.permute.xlu1 %1652  ;;  %v1650_v23 = vunpack.i.h.bf16 %v1648_v12  ;;  %v1649_v24 = vunpack.i.l.bf16 %v1648_v12  ;;  %v707_v12 = vsel %vm566_vm12, %v1624_v42, %v1625_v59 }
 0x15b   : > { %v1655_v18 = vunpack.i.h.bf16 %v1653_v13  ;;  %v1654_v19 = vunpack.i.l.bf16 %v1653_v13 }
 0x15c   : > { %v655_v61 = vsel %vm510_vm10, %v1649_v24, %v1650_v23 }
 0x15d   : > { %v2403_v21 = vpop.permute.xlu0 %1662  ;;  %v682_v25 = vsel %vm539_vm9, %v1654_v19, %v1655_v18  ;;  %v730_v27 = vsel %vm584_vm8, %v1620_v11, %v1655_v18 }
 0x15e   : > { %v1658_v29 = vpop.permute.xlu1 %1657  ;;  %v729_v31 = vsel %vm584_vm8, %v667_v20, %v682_v25  ;;  %v1664_v50 = vunpack.i.l.bf16 %v2403_v21  ;;  %v1665_v60 = vunpack.i.h.bf16 %v2403_v21 }
 0x15f   : > { %v1660_v10 = vunpack.i.h.bf16 %v1658_v29  ;;  %v1659_v32 = vunpack.i.l.bf16 %v1658_v29  ;;  %v1721_v36 = vpack.i.bf16 %v730_v27, %v729_v31  ;;  %v1630_v29 = vunpack.i.h.bf16 %v2325_v17 }
 0x161   : > { %v1673_v33 = vpop.permute.xlu0 %1672  ;;  %v640_v16 = vsel %vm494_vm11, %v1659_v32, %v1660_v10  ;;  %1722 = vrot.lane.b32.xlu0 %v1721_v36, %s1992_s27  ;;  %v727_v40 = vsel %vm584_vm8, %v1660_v10, %v1650_v23  ;;  %v639_v14 = vsel %vm494_vm11, %v1664_v50, %v1659_v32 }
 0x162   : > { %v1668_v38 = vpop.permute.xlu1 %1667  ;;  %v726_v39 = vsel %vm584_vm8, %v640_v16, %v655_v61  ;;  %v1674_v48 = vunpack.i.l.bf16 %v1673_v33  ;;  %v1675_v56 = vunpack.i.h.bf16 %v1673_v33 }
 0x163   : > { %v1726_v45 = vpack.i.bf16 %v727_v40, %v726_v39  ;;  %v1669_v46 = vunpack.i.l.bf16 %v1668_v38  ;;  %v1670_v1 = vunpack.i.h.bf16 %v1668_v38  ;;  %v1635_v38 = vunpack.i.h.bf16 %v2392_v22 }
 0x164   : > { %v696_v26 = vsel %vm554_vm13, %v1674_v48, %v1675_v56  ;;  %v733_v23 = vsel %vm584_vm8, %v1675_v56, %v1625_v59 }
 0x165   : > { %v2415_v34 = vpop.permute.xlu0 %1682  ;;  %1727 = vrot.lane.b32.xlu0 %v1726_v45, %s1992_s27  ;;  %v654_v57 = vsel %vm510_vm10, %v1669_v46, %v1649_v24  ;;  %v732_v21 = vsel %vm584_vm8, %v696_v26, %v707_v12  ;;  %v1012_v26 = vld [vmem:[%s2720_s4] sm:$0xf] }
 0x166   : > { %v1684_v49 = vunpack.i.l.bf16 %v2415_v34  ;;  %v2420_v35 = vpop.permute.xlu1 %1677  ;;  %v725_v63 = vsel %vm584_vm8, %v639_v14, %v654_v57  ;;  %v1685_v32 = vunpack.i.h.bf16 %v2415_v34  ;;  %v1736_v16 = vpack.i.bf16 %v733_v23, %v732_v21 }
 0x167   : > { %v1679_v55 = vunpack.i.l.bf16 %v2420_v35  ;;  %v1731_v18 = vpack.i.bf16 %v725_v63, %v2339_v30  ;;  %v1680_v31 = vunpack.i.h.bf16 %v2420_v35  ;;  %v1993_v34 = vmov 0.0  }
 0x168   : > { %v695_v54 = vsel %vm554_vm13, %v1684_v49, %v1674_v48  ;;  %867 = vmatprep.mubr.f32.mxu0 %v1993_v34  ;;  %1362 = vmatprep.mubr.f32.mxu1 %v1993_v34 }
 0x169   : > { %v2426_v51 = vpop.permute.xlu0 %1687  ;;  %v731_v58 = vsel %vm584_vm8, %v695_v54, %v706_v53  ;;  %v681_v37 = vsel %vm539_vm9, %v1679_v55, %v1654_v19 }
 0x16a   : > { %v717_v47 = vpop.permute.xlu1 %716  ;;  %v728_v62 = vsel %vm584_vm8, %v2336_v28, %v681_v37  ;;  %v1645_v28 = vunpack.i.h.bf16 %v2394_v44  ;;  %v1689_v33 = vunpack.i.l.bf16 %v2426_v51  ;;  %v1690_v56 = vunpack.i.h.bf16 %v2426_v51 }
 0x16b   : > { %v721_v15 = vsel %vm2736_vm14, %v717_v47, %v719_v4  ;;  %v1746_v52 = vpack.i.bf16 %v731_v58, %v728_v62  ;;  %v496_v4 = vsel %vm494_vm11, %v1665_v60, %v1644_v0  ;;  %v720_v50 = vsel %vm2736_vm14, %v2397_v5, %v717_v47 }
 0x16c   : > { %772 = vrot.lane.b32.xlu1 %v721_v15, %s1992_s27  ;;  %v495_v30 = vsel %vm494_vm11, %v1645_v28, %v1665_v60  ;;  %v525_v22 = vsel %vm523_vm7, %v1630_v29, %v1689_v33  ;;  %v524_v14 = vsel %vm523_vm7, %v1690_v56, %v1630_v29  ;;  %v1994_v15 = vmov 0  }
 0x16d   : > { %v1693_v2 = vpop.permute.xlu0 %1692  ;;  %1747 = vrot.lane.b32.xlu0 %v1746_v52, %s1992_s27  ;;  %1771 = vset.pattern.permute.xlu1 %v1994_v15 }
 0x16e   : > { %v1695_v3 = vunpack.i.h.bf16 %v1693_v2  ;;  %v1694_v11 = vunpack.i.l.bf16 %v1693_v2  ;;  %v1703_v13 = vpop.permute.xlu1 %1702  ;;  %1837 = vset.pattern.permute.xlu0 %v1994_v15 }
 0x16f   : > { %v1704_v20 = vunpack.i.l.bf16 %v1703_v13  ;;  %v1705_v48 = vunpack.i.h.bf16 %v1703_v13 }
 0x170   : > { %v512_v19 = vsel %vm510_vm10, %v1670_v1, %v1694_v11  ;;  %v511_v24 = vsel %vm510_vm10, %v1695_v3, %v1670_v1  ;;  %1732 = vrot.lane.b32.xlu1 %v1731_v18, %s1992_s27  ;;  %v590_v44 = vsel %vm584_vm8, %v1644_v0, %v1694_v11 }
 0x171   : > { %v1698_v25 = vpop.permute.xlu0 %1697  ;;  %v589_v27 = vsel %vm584_vm8, %v496_v4, %v512_v19  ;;  %v541_v39 = vsel %vm539_vm9, %v1680_v31, %v1704_v20  ;;  %v588_v42 = vsel %vm584_vm8, %v495_v30, %v511_v24  ;;  %v593_v55 = vsel %vm584_vm8, %v1689_v33, %v1704_v20 }
 0x172   : > { %v1699_v10 = vunpack.i.l.bf16 %v1698_v25  ;;  %v1708_v36 = vpop.permute.xlu1 %1707  ;;  %v1751_v61 = vpack.i.bf16 %v590_v44, %v589_v27  ;;  %v1700_v17 = vunpack.i.h.bf16 %v1698_v25  ;;  %v1756_v49 = vpack.i.bf16 %v588_v42, %v2349_v41 }
 0x173   : > { %v1709_v40 = vunpack.i.l.bf16 %v1708_v36  ;;  %v1710_v45 = vunpack.i.h.bf16 %v1708_v36  ;;  %v592_v54 = vsel %vm584_vm8, %v525_v22, %v541_v39  ;;  %v540_v41 = vsel %vm539_vm9, %v1705_v48, %v1680_v31 }
 0x174   : > { %v556_v43 = vsel %vm554_vm13, %v1685_v32, %v1699_v10  ;;  %1752 = vrot.lane.b32.xlu0 %v1751_v61, %s1992_s27  ;;  %1737 = vrot.lane.b32.xlu1 %v1736_v16, %s1992_s27  ;;  %v555_v57 = vsel %vm554_vm13, %v1700_v17, %v1685_v32  ;;  %v1741_v59 = vpack.i.bf16 %v593_v55, %v592_v54 }
 0x175   : > { %v568_v46 = vsel %vm566_vm12, %v1635_v38, %v1709_v40  ;;  %v596_v53 = vsel %vm584_vm8, %v1699_v10, %v1709_v40  ;;  %v567_v58 = vsel %vm566_vm12, %v1710_v45, %v1635_v38  ;;  %v578_v5 = vpop.permute.xlu0 %577  ;;  %v591_v51 = vsel %vm584_vm8, %v524_v14, %v540_v41 }
 0x176   : > { %v595_v35 = vsel %vm584_vm8, %v556_v43, %v568_v46  ;;  %v594_v60 = vsel %vm584_vm8, %v555_v57, %v567_v58  ;;  %v580_v47 = vpop.permute.xlu1 %579 }
 0x177   : > { %v1761_v37 = vpack.i.bf16 %v596_v53, %v595_v35  ;;  %v1766_v62 = vpack.i.bf16 %v594_v60, %v591_v51  ;;  %v583_v52 = vsel %vm2736_vm14, %v578_v5, %v580_v47 }
 0x178   : > { %1757 = vrot.lane.b32.xlu0 %v1756_v49, %s1992_s27  ;;  %770 = vrot.lane.b32.xlu1 %v720_v50, %s1992_s27 }
 0x179   : > { %v576_v63 = vpop.permute.xlu0 %575 }
 0x17a   : > { %v582_v0 = vsel %vm2736_vm14, %v576_v63, %v578_v5  ;;  %v1713_v1 = vpop.permute.xlu1 %1712  ;;  %vm2737_vm14 = vcmask 293888  }
 0x17b   : > { %v1715_v11 = vunpack.i.h.bf16 %v1713_v1  ;;  %v1714_v12 = vunpack.i.l.bf16 %v1713_v1 }
 0x17c   : > { %1762 = vrot.lane.b32.xlu0 %v1761_v37, %s1992_s27  ;;  %1742 = vrot.lane.b32.xlu1 %v1741_v59, %s1992_s27 }
 0x17d   : > { %v778_v19 = vsel %vm776_vm15, %v1714_v12, %v1715_v11 }
 0x17e   : > { %v1718_v18 = vpop.permute.xlu1 %1717 }
 0x17f   : > { %v1720_v22 = vunpack.i.h.bf16 %v1718_v18  ;;  %v1719_v48 = vunpack.i.l.bf16 %v1718_v18 }
 0x180   : > { %912 = vrot.lane.b32.xlu0 %v583_v52, %s1992_s27  ;;  %1767 = vrot.lane.b32.xlu1 %v1766_v62, %s1992_s27  ;;  %v597_v62 = vld [vmem:[%s2719_s3] sm:$0xf] }
 0x181   : > { %v917_v59 = vsel %vm776_vm15, %v1719_v48, %v1720_v22 }
 0x184   : > { %910 = vrot.lane.b32.xlu0 %v582_v0, %s1992_s27  ;;  %914 = vrot.lane.b32.xlu1 %v580_v47, %s1992_s27 }
 0x188   : > { %1015 = vperm.xlu1 %1771, %v1012_v26   ;;  %1058 = vrot.lane.b32.xlu0 %v2214_v8, %s1980_s24 }
 0x18c   : > { %1060 = vrot.lane.b32.xlu1 %v2216_v9, %s1980_s24  ;;  %1047 = vrot.lane.b32.xlu0 %v2210_v6, %s1978_s19 }
 0x190   : > { %1049 = vrot.lane.b32.xlu1 %v2212_v7, %s1978_s19  ;;  %s1995_s19 = smov 32  }
 0x1c8   : > { %v775_v2 = vpop.permute.xlu0 %774 }
 0x1d3   : > { %v1723_v3 = vpop.permute.xlu0 %1722 }
 0x1d4   : > { %v1725_v29 = vunpack.i.h.bf16 %v1723_v3  ;;  %v1724_v30 = vunpack.i.l.bf16 %v1723_v3 }
 0x1d6   : > { %v782_v40 = vsel %vm776_vm15, %v1724_v30, %v1725_v29 }
 0x1d7   : > { %v1728_v28 = vpop.permute.xlu0 %1727 }
 0x1d8   : > { %v1730_v4 = vunpack.i.h.bf16 %v1728_v28  ;;  %v1729_v13 = vunpack.i.l.bf16 %v1728_v28 }
 0x1da   : > { %v780_v20 = vsel %vm776_vm15, %v1729_v13, %v1730_v4 }
 0x1db   : > { %v1506_v21 = vpack.c.bf16 %v780_v20, %v778_v19 }
 0x1dd   : > { %1507 = vmatprep.subr.bf16.mxu0 %v1506_v21  ;;  %v389_v21 = vld [vmem:[%s2718_s2] sm:$0xf] }
 0x1de   : > { %v773_v23 = vpop.permute.xlu1 %772 }
 0x1df   : > { %v1748_v24 = vpop.permute.xlu0 %1747  ;;  %v786_v56 = vsel %vm776_vm15, %v773_v23, %v775_v2 }
 0x1e0   : > { %v1749_v31 = vunpack.i.l.bf16 %v1748_v24  ;;  %v1750_v16 = vunpack.i.h.bf16 %v1748_v24 }
 0x1e2   : > { %v1733_v25 = vpop.permute.xlu1 %1732  ;;  %v781_v42 = vsel %vm776_vm15, %v1749_v31, %v1724_v30 }
 0x1e3   : > { %v1735_v27 = vunpack.i.h.bf16 %v1733_v25  ;;  %v1734_v44 = vunpack.i.l.bf16 %v1733_v25 }
 0x1e5   : > { %v777_v10 = vsel %vm776_vm15, %v1734_v44, %v1714_v12  ;;  %v779_v32 = vsel %vm776_vm15, %v1735_v27, %v1729_v13 }
 0x1e6   : > { %v1753_v33 = vpop.permute.xlu0 %1752  ;;  %v1738_v36 = vpop.permute.xlu1 %1737  ;;  %v1508_v61 = vpack.c.bf16 %v779_v32, %v777_v10 }
 0x1e7   : > { %v1740_v38 = vunpack.i.h.bf16 %v1738_v36  ;;  %v1739_v39 = vunpack.i.l.bf16 %v1738_v36  ;;  %v1755_v17 = vunpack.i.h.bf16 %v1753_v33  ;;  %v1754_v43 = vunpack.i.l.bf16 %v1753_v33 }
 0x1e8   : > { %1509 = vmatpush1.bf16.msra.mxu0 %v1508_v61 }
 0x1e9   : > { %v784_v45 = vsel %vm776_vm15, %v1739_v39, %v1740_v38  ;;  %v783_v46 = vsel %vm776_vm15, %v1750_v16, %v1739_v39  ;;  %v919_v57 = vsel %vm776_vm15, %v1754_v43, %v1755_v17 }
 0x1ea   : > { %v1758_v49 = vpop.permute.xlu0 %1757  ;;  %v771_v50 = vpop.permute.xlu1 %770  ;;  %v1510_v35 = vpack.c.bf16 %v784_v45, %v782_v40  ;;  %v1512_v53 = vpack.c.bf16 %v783_v46, %v781_v42  ;;  %v1514_v52 = vpack.c.bf16 %v919_v57, %v917_v59 }
 0x1eb   : > { %v1760_v54 = vunpack.i.h.bf16 %v1758_v49  ;;  %v1759_v55 = vunpack.i.l.bf16 %v1758_v49  ;;  %v785_v15 = vsel %vm776_vm15, %v771_v50, %v773_v23 }
 0x1ec   : > { %1511 = vmatprep.subr.bf16.mxu0 %v1510_v35 }
 0x1ed   : > { %1513 = vmatpush1.bf16.msra.mxu0 %v1512_v53  ;;  %v916_v58 = vsel %vm776_vm15, %v1759_v55, %v1719_v48  ;;  %v918_v41 = vsel %vm776_vm15, %v1760_v54, %v1754_v43 }
 0x1ee   : > { %v1763_v5 = vpop.permute.xlu0 %1762  ;;  %v1743_v37 = vpop.permute.xlu1 %1742  ;;  %1491 = vmatprep.subr.msk.mxu0 %vm584_vm8, %v786_v56  ;;  %v1516_v63 = vpack.c.bf16 %v918_v41, %v916_v58 }
 0x1ef   : > { %v1765_v60 = vunpack.i.h.bf16 %v1763_v5  ;;  %v1764_v14 = vunpack.i.l.bf16 %v1763_v5  ;;  %v1745_v47 = vunpack.i.h.bf16 %v1743_v37  ;;  %v1744_v51 = vunpack.i.l.bf16 %v1743_v37 }
 0x1f1   : > { %1492 = vmatpush1.msk.msra.mxu0 %vm584_vm8, %v785_v15  ;;  %v921_v0 = vsel %vm776_vm15, %v1744_v51, %v1745_v47  ;;  %v923_v26 = vsel %vm776_vm15, %v1764_v14, %v1765_v60 }
 0x1f2   : > { %v913_v2 = vpop.permute.xlu0 %912  ;;  %v1768_v1 = vpop.permute.xlu1 %1767  ;;  %1515 = vmatprep.subr.bf16.mxu0 %v1514_v52  ;;  %1493 = vmatmul.mubr.msk.f32.vlgmr.msra.gmra.mrb[0].mxu0 %vm2737_vm14, %v597_v62  ;;  %v1518_v3 = vpack.c.bf16 %v923_v26, %v921_v0 }
 0x1f3   : > { %v1770_v11 = vunpack.i.h.bf16 %v1768_v1  ;;  %v1769_v12 = vunpack.i.l.bf16 %v1768_v1  ;;  %1517 = vmatpush1.bf16.msra.mxu0 %v1516_v63  ;;  %1005 = vmatprep.mubr.f32.mxu0 %v1993_v34 }
 0x1f4   : > { %1519 = vmatprep.subr.bf16.mxu0 %v1518_v3 }
 0x1f5   : > { %v922_v28 = vsel %vm776_vm15, %v1770_v11, %v1764_v14  ;;  %v920_v4 = vsel %vm776_vm15, %v1769_v12, %v1744_v51 }
 0x1f6   : > { %v1520_v13 = vpack.c.bf16 %v922_v28, %v920_v4  ;;  %v915_v18 = vpop.permute.xlu1 %914  ;;  %v911_v20 = vpop.permute.xlu0 %910 }
 0x1f7   : > { %v925_v19 = vsel %vm776_vm15, %v913_v2, %v915_v18  ;;  %v924_v23 = vsel %vm776_vm15, %v911_v20, %v913_v2 }
 0x1f8   : > { %1521 = vmatpush1.bf16.msra.mxu0 %v1520_v13 }
 0x1f9   : > { %1494 = vmatprep.subr.msk.mxu0 %vm584_vm8, %v925_v19 }
 0x1fa   : > { %v1059_v31 = vpop.permute.xlu0 %1058 }
 0x1fc   : > { %1495 = vmatpush1.msk.msra.mxu0 %vm584_vm8, %v924_v23 }
 0x1fd   : > { %1496 = vmatmul.mubr.msk.f32.vlgmr.msra.gmra.mrb[0].mxu0 %vm2737_vm14, %v389_v21  ;;  %vm1028_vm14 = vcmask 261120  }
 0x1fe   : > { %v1048_v32 = vpop.permute.xlu0 %1047 }
 0x207   : > { %v1016_v34 = vpop.permute.xlu1 %1015 }
 0x20b   : > { %v1061_v10 = vpop.permute.xlu1 %1060 }
 0x20c   : > { %v1062_v50 = vsel %vm433_vm1, %v1059_v31, %v1061_v10 }
 0x20f   : > { %v1050_v33 = vpop.permute.xlu1 %1049 }
 0x2d0   : > { %v1007_v24 = vpop.f32.mrb[0].mxu0 }
 0x2d1   : > { %v1018_v25 = vadd.f32 %v1016_v34, %v1007_v24  ;;  %v1009_v27 = vpop.f32.mrb[1].mxu0 }
 0x2d2   : > { %v1019_v44 = vadd.f32 %v1016_v34, %v1009_v27 }
 0x2d3   : > { %v1020_v29 = vmax.f32 %v1018_v25, 0.0 }
 0x2d4   : > { %v1021_v30 = vmax.f32 %v1019_v44, 0.0 }
 0x2d5   : > { %1024 = vrot.lane.b32.xlu0 %v1020_v29, %s1995_s19 }
 0x2d6   : > { %1026 = vrot.lane.b32.xlu1 %v1021_v30, %s1995_s19 }
 0x2d9   : > { %1069 = vrot.lane.b32.xlu0 %v2210_v6, %s1981_s0 }
 0x2da   : > { %1071 = vrot.lane.b32.xlu1 %v2212_v7, %s1981_s0  ;;  %s2753_s0 = smov 110  }
 0x2dd   : > { %1080 = vrot.lane.b32.xlu0 %v2214_v8, %s1979_s22 }
 0x2de   : > { %1082 = vrot.lane.b32.xlu1 %v2216_v9, %s1979_s22  ;;  %s2752_s22 = smov 96  }
 0x2e1   : > { %1091 = vrot.lane.b32.xlu0 %v2210_v6, %s1982_s26  ;;  %v1051_v6 = vsel %vm424_vm0, %v1048_v32, %v1050_v33  ;;  %vm2755_vm0 = vcmask 769024  }
 0x2e2   : > { %1093 = vrot.lane.b32.xlu1 %v2212_v7, %s1982_s26  ;;  %s2754_s26 = smov 94   ;;  %vm2756_vm1 = vmmov %vm2755_vm0 }
 0x2e5   : > { %1036 = vrot.lane.b32.xlu0 %v2214_v8, %s1984_s23 }
 0x2e6   : > { %1038 = vrot.lane.b32.xlu1 %v2216_v9, %s1984_s23 }
 0x347   : > { %v1025_v36 = vpop.permute.xlu0 %1024 }
 0x348   : > { %v2551_v61 = vsel %vm1028_vm14, 0.0, %v1025_v36  ;;  %v1027_v16 = vpop.permute.xlu1 %1026 }
 0x349   : > { %v2554_v38 = vsel %vm1028_vm14, %v1025_v36, %v1027_v16  ;;  %v2556_v7 = vsel %vm1028_vm14, %v1027_v16, 0.0  ;;  %1149 = vrot.lane.b32.xlu0 %v2551_v61, %s1985_s28  ;;  %v1104_v8 = vrot.slane %v2551_v61, 4  ;;  %v1055_v48 = vmul.f32 %v1048_v32, %v2551_v61 }
 0x34a   : > { %v1772_v9 = vpack.i.bf16 %v2556_v7, %v2554_v38  ;;  %v1056_v39 = vmul.f32 %v1051_v6, %v2554_v38  ;;  %v1057_v40 = vmul.f32 %v1050_v33, %v2556_v7  ;;  %v1105_v45 = vrot.slane %v2554_v38, 4 }
 0x34b   : > { %v1070_v42 = vpop.permute.xlu0 %1069  ;;  %1107 = vrot.lane.b32.xlu1 %v1104_v8, %s1983_s16  ;;  %v1106_v46 = vrot.slane %v2556_v7, 4  ;;  %v1066_v54 = vmul.f32 %v1059_v31, %v2551_v61  ;;  %v1067_v56 = vmul.f32 %v1062_v50, %v2554_v38  ;;  %v1068_v41 = vmul.f32 %v1061_v10, %v2556_v7 }
 0x34c   : > { %v1072_v17 = vpop.permute.xlu1 %1071  ;;  %v1782_v43 = vpack.i.bf16 %v1057_v40, %v1056_v39  ;;  %v1077_v5 = vmul.f32 %v1070_v42, %v2551_v61 }
 0x34d   : > { %1773 = vrot.lane.b32.xlu0 %v1772_v9, %s1985_s28  ;;  %v1792_v53 = vpack.i.bf16 %v1106_v46, %v1105_v45  ;;  %v1073_v55 = vsel %vm442_vm4, %v1070_v42, %v1072_v17  ;;  %v1079_v59 = vmul.f32 %v1072_v17, %v2556_v7  ;;  %v1135_v60 = vrot.slane %v1066_v54, 4 }
 0x34e   : > { %v1078_v37 = vmul.f32 %v1073_v55, %v2554_v38  ;;  %v1136_v47 = vrot.slane %v1067_v56, 4  ;;  %v1137_v51 = vrot.slane %v1068_v41, 4  ;;  %v1163_v62 = vrot.slane %v1077_v5, 4 }
 0x34f   : > { %v1081_v22 = vpop.permute.xlu0 %1080  ;;  %1783 = vrot.lane.b32.xlu1 %v1782_v43, %s1987_s17  ;;  %v1165_v52 = vrot.slane %v1079_v59, 4 }
 0x350   : > { %v1083_v49 = vpop.permute.xlu1 %1082  ;;  %v1164_v15 = vrot.slane %v1078_v37, 4  ;;  %v1797_v63 = vpack.i.bf16 %v1137_v51, %v1136_v47  ;;  %v1088_v1 = vmul.f32 %v1081_v22, %v2551_v61 }
 0x351   : > { %v1084_v35 = vsel %vm451_vm2, %v1081_v22, %v1083_v49  ;;  %1121 = vrot.lane.b32.xlu0 %v1055_v48, %s1987_s17  ;;  %v1090_v58 = vmul.f32 %v1083_v49, %v2556_v7  ;;  %vm2757_vm2 = vcmask 293888   ;;  %s1490_s17 = sshll.u32 %s2189_s14, 3 }
 0x352   : > { %v1089_v57 = vmul.f32 %v1084_v35, %v2554_v38  ;;  %v1802_v2 = vpack.i.bf16 %v1165_v52, %v1164_v15 }
 0x353   : > { %1793 = vrot.lane.b32.xlu1 %v1792_v53, %s1986_s18  ;;  %v1092_v0 = vpop.permute.xlu0 %1091 }
 0x354   : > { %v1787_v14 = vpack.i.bf16 %v1090_v58, %v1089_v57  ;;  %v1094_v26 = vpop.permute.xlu1 %1093  ;;  %v1099_v28 = vmul.f32 %v1092_v0, %v2551_v61 }
 0x355   : > { %1778 = vrot.lane.b32.xlu0 %v1792_v53, %s1983_s16  ;;  %v1095_v3 = vsel %vm460_vm3, %v1092_v0, %v1094_v26  ;;  %v1101_v12 = vmul.f32 %v1094_v26, %v2556_v7 }
 0x356   : > { %v1100_v11 = vmul.f32 %v1095_v3, %v2554_v38 }
 0x357   : > { %1138 = vrot.lane.b32.xlu1 %v1135_v60, %s1989_s11  ;;  %v1037_v4 = vpop.permute.xlu0 %1036 }
 0x358   : > { %v1039_v13 = vpop.permute.xlu1 %1038 }
 0x359   : > { %1788 = vrot.lane.b32.xlu0 %v1787_v14, %s2752_s22  ;;  %v1040_v24 = vsel %vm405_vm6, %v1037_v4, %v1039_v13  ;;  %v1046_v27 = vmul.f32 %v1039_v13, %v2556_v7  ;;  %v1044_v7 = vmul.f32 %v1037_v4, %v2551_v61 }
 0x35a   : > { %v1045_v30 = vmul.f32 %v1040_v24, %v2554_v38 }
 0x35b   : > { %1166 = vrot.lane.b32.xlu1 %v1163_v62, %s2753_s0 }
 0x35d   : > { %1798 = vrot.lane.b32.xlu0 %v1797_v63, %s1989_s11  ;;  %s1505_s11 = sshll.u32 %s2068_s13, 7  ;;  %s1996_s13 = smov [#allocation7]  }
 0x35e   : > { %s2672_s19 = scalar_lea.hbm %s2725_s9, %s1505_s11 }
 0x35f   : > { %1803 = vrot.lane.b32.xlu1 %v1802_v2, %s2753_s0 }
 0x361   : > { %1180 = vrot.lane.b32.xlu0 %v1088_v1, %s2752_s22  ;;  %s1377_s22 = scalar_lea.sflag [#allocation4], %s2189_s14 }
 0x363   : > { %1191 = vrot.lane.b32.xlu1 %v1104_v8, %s1986_s18 }
 0x365   : > { %1207 = vrot.lane.b32.xlu0 %v1100_v11, %s2754_s26 }
 0x367   : > { %1209 = vrot.lane.b32.xlu1 %v1101_v12, %s2754_s26 }
 0x369   : > { %1205 = vrot.lane.b32.xlu0 %v1099_v28, %s2754_s26  ;;  %s1908_s26 = sshll.u32 %s1996_s13, 4  ;;  %s1909_s26 = int_to_ptr.vmem [resolvable:$false] %s1908_s26 }
 0x36a   : > { %s1910_s16 = scalar_lea.vmem %s1909_s26, 256 }
 0x3bb   : > { %v2600_v18 = vpop.permute.xlu0 %1149 }
 0x3bd   : > { %v1108_v19 = vpop.permute.xlu1 %1107 }
 0x3bf   : > { %v2602_v20 = vpop.permute.xlu0 %1773 }
 0x3c0   : > { %v1776_v39 = vunpack.i.h.bf16 %v2602_v20  ;;  %v1775_v17 = vunpack.i.l.bf16 %v2602_v20 }
 0x3c1   : > { %v1784_v21 = vpop.permute.xlu1 %1783 }
 0x3c2   : > { %v1786_v16 = vunpack.i.h.bf16 %v1784_v21  ;;  %v1785_v6 = vunpack.i.l.bf16 %v1784_v21  ;;  %v1156_v37 = vsel %vm523_vm7, %v1775_v17, %v1776_v39  ;;  %v1155_v4 = vsel %vm523_vm7, %v2600_v18, %v1775_v17  ;;  %v1225_v18 = vld [vmem:[%s2722_s6] sm:$0xf] }
 0x3c3   : > { %v1122_v23 = vpop.permute.xlu0 %1121 }
 0x3c4   : > { %v1128_v43 = vsel %vm494_vm11, %v1785_v6, %v1786_v16  ;;  %v1127_v22 = vsel %vm494_vm11, %v1122_v23, %v1785_v6 }
 0x3c5   : > { %v1794_v34 = vpop.permute.xlu1 %1793 }
 0x3c6   : > { %v1796_v48 = vunpack.i.h.bf16 %v1794_v34  ;;  %v1795_v49 = vunpack.i.l.bf16 %v1794_v34 }
 0x3c7   : > { %v1779_v25 = vpop.permute.xlu0 %1778 }
 0x3c8   : > { %v1781_v44 = vunpack.i.h.bf16 %v1779_v25  ;;  %v1780_v29 = vunpack.i.l.bf16 %v1779_v25  ;;  %v1198_v47 = vsel %vm566_vm12, %v1795_v49, %v1796_v48 }
 0x3c9   : > { %v1139_v31 = vpop.permute.xlu1 %1138 }
 0x3ca   : > { %v1114_v10 = vsel %vm479_vm5, %v1780_v29, %v1781_v44  ;;  %v1215_v32 = vsel %vm584_vm8, %v1046_v27, %v1781_v44  ;;  %v1113_v50 = vsel %vm479_vm5, %v1108_v19, %v1780_v29 }
 0x3cb   : > { %v1789_v33 = vpop.permute.xlu0 %1788  ;;  %v1214_v36 = vsel %vm584_vm8, %v1045_v30, %v1114_v10  ;;  %v1213_v14 = vsel %vm584_vm8, %v1044_v7, %v1113_v50 }
 0x3cc   : > { %v1807_v8 = vpack.i.bf16 %v1215_v32, %v1214_v36  ;;  %v1791_v40 = vunpack.i.h.bf16 %v1789_v33  ;;  %v1790_v38 = vunpack.i.l.bf16 %v1789_v33 }
 0x3cd   : > { %v1167_v9 = vpop.permute.xlu1 %1166 }
 0x3ce   : > { %1808 = vrot.lane.b32.xlu1 %v1807_v8, %s1992_s27  ;;  %v1187_v56 = vsel %vm554_vm13, %v1790_v38, %v1791_v40  ;;  %v1224_v26 = vsel %vm584_vm8, %v1791_v40, %v1796_v48 }
 0x3cf   : > { %v1799_v42 = vpop.permute.xlu0 %1798  ;;  %v1223_v0 = vsel %vm584_vm8, %v1187_v56, %v1198_v47 }
 0x3d0   : > { %v1801_v45 = vunpack.i.h.bf16 %v1799_v42  ;;  %v1800_v46 = vunpack.i.l.bf16 %v1799_v42  ;;  %v1822_v28 = vpack.i.bf16 %v1224_v26, %v1223_v0 }
 0x3d1   : > { %v1804_v35 = vpop.permute.xlu1 %1803 }
 0x3d2   : > { %v1144_v61 = vsel %vm510_vm10, %v1139_v31, %v1800_v46  ;;  %v1145_v53 = vsel %vm510_vm10, %v1800_v46, %v1801_v45  ;;  %v1806_v54 = vunpack.i.h.bf16 %v1804_v35  ;;  %v1805_v55 = vunpack.i.l.bf16 %v1804_v35 }
 0x3d3   : > { %v1181_v57 = vpop.permute.xlu0 %1180  ;;  %v1217_v58 = vsel %vm584_vm8, %v1128_v43, %v1145_v53  ;;  %v1218_v41 = vsel %vm584_vm8, %v1786_v16, %v1801_v45  ;;  %v1216_v5 = vsel %vm584_vm8, %v1127_v22, %v1144_v61 }
 0x3d4   : > { %v1173_v59 = vsel %vm539_vm9, %v1805_v55, %v1806_v54  ;;  %v1812_v60 = vpack.i.bf16 %v1218_v41, %v1217_v58  ;;  %v1817_v62 = vpack.i.bf16 %v1216_v5, %v1213_v14  ;;  %v1221_v52 = vsel %vm584_vm8, %v1776_v39, %v1806_v54 }
 0x3d5   : > { %v1192_v51 = vpop.permute.xlu1 %1191  ;;  %v1220_v15 = vsel %vm584_vm8, %v1156_v37, %v1173_v59  ;;  %v1172_v2 = vsel %vm539_vm9, %v1167_v9, %v1805_v55  ;;  %v1186_v1 = vsel %vm554_vm13, %v1181_v57, %v1790_v38  ;;  %v1035_v57 = vld [vmem:[%s2721_s5] sm:$0xf] }
 0x3d6   : > { %v1197_v63 = vsel %vm566_vm12, %v1192_v51, %v1795_v49  ;;  %1813 = vrot.lane.b32.xlu0 %v1812_v60, %s1992_s27  ;;  %1818 = vrot.lane.b32.xlu1 %v1817_v62, %s1992_s27  ;;  %v1827_v3 = vpack.i.bf16 %v1221_v52, %v1220_v15  ;;  %v1219_v19 = vsel %vm584_vm8, %v1155_v4, %v1172_v2 }
 0x3d7   : > { %v1222_v11 = vsel %vm584_vm8, %v1186_v1, %v1197_v63  ;;  %v1208_v12 = vpop.permute.xlu0 %1207 }
 0x3d8   : > { %v1832_v20 = vpack.i.bf16 %v1222_v11, %v1219_v19 }
 0x3d9   : > { %v1210_v13 = vpop.permute.xlu1 %1209 }
 0x3da   : > { %1828 = vrot.lane.b32.xlu0 %v1827_v3, %s1992_s27  ;;  %1823 = vrot.lane.b32.xlu1 %v1822_v28, %s1992_s27  ;;  %v1212_v21 = vsel %vm2755_vm0, %v1208_v12, %v1210_v13 }
 0x3db   : > { %v1206_v23 = vpop.permute.xlu0 %1205 }
 0x3dc   : > { %v1211_v34 = vsel %vm2756_vm1, %v1206_v23, %v1208_v12 }
 0x3de   : > { %1833 = vrot.lane.b32.xlu0 %v1832_v20, %s1992_s27  ;;  %1269 = vrot.lane.b32.xlu1 %v1212_v21, %s1992_s27 }
 0x3e2   : > { %1271 = vrot.lane.b32.xlu0 %v1210_v13, %s1992_s27  ;;  %1267 = vrot.lane.b32.xlu1 %v1211_v34, %s1992_s27  ;;  %s386_s27 = scalar_lea.vmem [#allocation7], %s1490_s17 }
 0x3e3   : > { %s1391_s24 = sshll.u32 %s386_s27, 4  ;;  %s2674_s24 = int_to_ptr.vmem [resolvable:$true] %s1391_s24 }
 0x3e4   : > { %s1904_s0 = scalar_lea.vmem %s2674_s24, 128  ;;  %p1911_p8 = scmp.lt.s32.totalorder %s2674_s24, %s1909_s26 }
 0x3e5   : > { %p1905_p13 = scmp.ne.s32.totalorder %s2674_s24, %s1904_s0  ;;  %p1912_p9 = scmp.lt.s32.totalorder %s1910_s16, %s1904_s0 }
 0x3e6   : > { %1228 = vperm.xlu0 %1837, %v1225_v18  }
 0x3e7   : > { %p1906_p5 = pnand %p1905_p13, %p2758_p3  ;;  %p1913_p0 = por %p1912_p9, %p1911_p8 }
 0x3e9   : > { %p1907_p7 = pneg %p1906_p5 }
 0x3eb   : > { %p1914_p1 = pnand %p1913_p0, %p1907_p7 }
 0x440   : > { %v1809_v24 = vpop.permute.xlu1 %1808 }
 0x441   : > { %v1811_v25 = vunpack.i.h.bf16 %v1809_v24  ;;  %v1810_v27 = vunpack.i.l.bf16 %v1809_v24 }
 0x443   : > { %v1274_v33 = vsel %vm776_vm15, %v1810_v27, %v1811_v25 }
 0x448   : > { %v1814_v44 = vpop.permute.xlu0 %1813  ;;  %v1819_v31 = vpop.permute.xlu1 %1818 }
 0x449   : > { %v1816_v29 = vunpack.i.h.bf16 %v1814_v44  ;;  %v1815_v30 = vunpack.i.l.bf16 %v1814_v44  ;;  %v1821_v10 = vunpack.i.h.bf16 %v1819_v31  ;;  %v1820_v32 = vunpack.i.l.bf16 %v1819_v31 }
 0x44b   : > { %v1276_v36 = vsel %vm776_vm15, %v1815_v30, %v1816_v29  ;;  %v1273_v8 = vsel %vm776_vm15, %v1820_v32, %v1810_v27  ;;  %v1275_v9 = vsel %vm776_vm15, %v1821_v10, %v1815_v30 }
 0x44c   : > { %v1829_v16 = vpop.permute.xlu0 %1828  ;;  %v1522_v6 = vpack.c.bf16 %v1276_v36, %v1274_v33  ;;  %v1824_v40 = vpop.permute.xlu1 %1823  ;;  %v1524_v38 = vpack.c.bf16 %v1275_v9, %v1273_v8 }
 0x44d   : > { %v1831_v7 = vunpack.i.h.bf16 %v1829_v16  ;;  %v1830_v39 = vunpack.i.l.bf16 %v1829_v16  ;;  %v1826_v42 = vunpack.i.h.bf16 %v1824_v40  ;;  %v1825_v17 = vunpack.i.l.bf16 %v1824_v40 }
 0x44e   : > { %1523 = vmatprep.subr.bf16.mxu1 %v1522_v6 }
 0x44f   : > { %1525 = vmatpush1.bf16.msra.mxu1 %v1524_v38  ;;  %v1278_v43 = vsel %vm776_vm15, %v1830_v39, %v1831_v7  ;;  %v1280_v46 = vsel %vm776_vm15, %v1825_v17, %v1826_v42 }
 0x450   : > { %v1834_v45 = vpop.permute.xlu0 %1833  ;;  %v1270_v49 = vpop.permute.xlu1 %1269  ;;  %v1526_v50 = vpack.c.bf16 %v1280_v46, %v1278_v43 }
 0x451   : > { %v1836_v22 = vunpack.i.h.bf16 %v1834_v45  ;;  %v1835_v48 = vunpack.i.l.bf16 %v1834_v45 }
 0x452   : > { %1527 = vmatprep.subr.bf16.mxu1 %v1526_v50 }
 0x453   : > { %v1277_v35 = vsel %vm776_vm15, %v1835_v48, %v1830_v39  ;;  %v1279_v61 = vsel %vm776_vm15, %v1836_v22, %v1825_v17 }
 0x454   : > { %v1272_v53 = vpop.permute.xlu0 %1271  ;;  %v1528_v54 = vpack.c.bf16 %v1279_v61, %v1277_v35  ;;  %v1268_v56 = vpop.permute.xlu1 %1267 }
 0x455   : > { %v1282_v55 = vsel %vm776_vm15, %v1270_v49, %v1272_v53  ;;  %v1281_v58 = vsel %vm776_vm15, %v1268_v56, %v1270_v49 }
 0x456   : > { %1529 = vmatpush1.bf16.msra.mxu1 %v1528_v54 }
 0x457   : > { %1497 = vmatprep.subr.msk.mxu1 %vm584_vm8, %v1282_v55 }
 0x45a   : > { %1498 = vmatpush1.msk.msra.mxu1 %vm584_vm8, %v1281_v58 }
 0x45b   : > { %1499 = vmatmul.mubr.msk.f32.vlgmr.msra.gmra.mrb[0].mxu1 %vm2757_vm2, %v1035_v57 }
 0x465   : > { %v1229_v41 = vpop.permute.xlu0 %1228 }
 0x52e   : > { %v1364_v5 = vpop.f32.mrb[0].mxu1 }
 0x52f   : > { %v1365_v37 = vadd.f32 %v1364_v5, %v1229_v41  ;;  %v1366_v59 = vpop.f32.mrb[1].mxu1 }
 0x530   : > { %v1367_v60 = vadd.f32 %v1366_v59, %v1229_v41 }
 0x531   : > { %v1369_v14 = vmax.f32 %v1365_v37, 0.0 }
 0x532   : > { %v1370_v47 = vmax.f32 %v1367_v60, 0.0 }
 0x534   : > { %v1373_v51 = vcombine.low %v1369_v14, %v1370_v47 }
 0x536   : > { %1375 = vst [vmem:[%s386_s27] sm:$0xff] %v1373_v51 }
 0x537   : > { %1917 = shalt.err (!%p1914_p1)
}
 0x538   : > { %s1918_s14 = scalar_lea.hbm %s2672_s19, 128  ;;  %s1922_s18 = scalar_lea.hbm %s2725_s9, 256 }
 0x539   : > { %p1919_p11 = scmp.ne.s32.totalorder %s2672_s19, %s1918_s14  ;;  %p1923_p4 = scmp.lt.u32.totalorder %s2672_s19, %s2725_s9 }
 0x53a   : > { %p1924_p10 = scmp.lt.u32.totalorder %s1922_s18, %s1918_s14  ;;  %p1926_p13 = scmp.lt.u32.totalorder %s1918_s14, %s2672_s19 }
 0x53b   : > { %p1920_p12 = pnand %p1919_p11, %p2758_p3 }
 0x53c   : > { %p1925_p6 = por %p1924_p10, %p1923_p4 }
 0x53d   : > { %p1921_p2 = pneg %p1920_p12 }
 0x53e   : > { %p1927_p5 = por %p1926_p13, %p1925_p6 }
 0x540   : > { %p1928_p7 = pnand %p1927_p5, %p1921_p2 }
 0x542   : > { %1931 = shalt.err (!%p1928_p7)
}
 0x543   : > { %1541 = dma.vmem_to_hbm [thread:$0]  (%p2758_p3), %s2674_s24, 128, %s2672_s19, %s1377_s22  }
 0x544 PF: > { %s1403_s27 = sand.u32 1, %s1962_s30   ;;  %p2759_p8 = scmp.ne.s32.totalorder %s2743_s21, 0 }
 0x545   : > { %p2760_p9 = scmp.ge.s32.totalorder %s1974_s12, 2  ;;  %s1404_s25 = scalar_lea.sflag [#allocation4], %s1403_s27 }
 0x547   : > { %p1551_p0 = pnand %p2760_p9, %p2759_p8 }
 0x549   : > { %1957 = dma.done.wait (!%p1551_p0), %s1404_s25, 128  }
 0x54a   : > { %1959 = vsyncadd (!%p1551_p0), %s1404_s25, 4294967168  ;;  %s2761_s29 = sld [smem:[#allocation11_spill]]  ;;  %s2762_s11 = sld [smem:[#allocation12_spill]] }
 0x54b   : > { %p25_p1 = scmp.ge.s32.totalorder %s2072_s15, 4   ;;  %s2763_s30 = smov %s1966_s10 }
 0x54c   : > { %s2765_s12 = smov %s2072_s15 }
 0x54d   :  { %27 = sbr.rel (!%p25_p1) target bundleno = 9 (0x9), region = 114 }
 0x550   : > { %s2764_s10 = smov %s2761_s29 }
 0x554   :  { %1409 = vsyncpa [#allocation3], 1 }
 0x555   :  { %1411 = vsyncpa [#allocation3 + $0x1], 1 }
 0x556   :  { %1412 = vsyncpa [#allocation6], 1 }
 0x557   :  { %1414 = vsyncpa [#allocation6 + $0x1], 1 }
 0x558   :  { %1415 = vsyncpa [#allocation4], 1 }
 0x559   :  { %1417 = vsyncpa [#allocation4 + $0x1], 1 }

</bundles_post_ra>
